<compile_context>
chip_gen: v5e
topology: v5e:2x2
jax: 0.10.0
libtpu: 0.0.40
codegen_flags: <defaults>
</compile_context>

<pallas_src>
import functools

import jax
import jax.numpy as jnp
from jax.experimental import pallas as pl
from jax.experimental.pallas import tpu as pltpu

EPS = 1e-5
VMEM_LIMIT = 32 * 1024 * 1024   # safe scoped-VMEM request on v5e/v6e/v7x


# ----------------------------------------------------------------------------
# helpers
# ----------------------------------------------------------------------------
def _round_up(x, m):
    return (x + m - 1) // m * m


def _pick_tile(n, target, quantum):
    """Largest multiple of `quantum` that divides n and is <= target (else n)."""
    if n <= target:
        return n
    t = (min(target, n) // quantum) * quantum
    while t >= quantum:
        if n % t == 0:
            return t
        t -= quantum
    return n


# ----------------------------------------------------------------------------
# fused matmul (+bias, +activation) kernels — used for all 1x1 convs
# ----------------------------------------------------------------------------
def _mm_kernel_single(x_ref, w_ref, b_ref, o_ref, *, act):
    y = jnp.dot(x_ref[...], w_ref[...], preferred_element_type=jnp.float32)
    y = y + b_ref[...]
    if act == "relu":
        y = jnp.maximum(y, 0.0)
    o_ref[...] = y.astype(o_ref.dtype)


def _mm_kernel_multi(x_ref, w_ref, b_ref, o_ref, acc_ref, *, act):
    @pl.when(pl.program_id(2) == 0)
    def _():
        acc_ref[...] = jnp.zeros_like(acc_ref)

    acc_ref[...] += jnp.dot(x_ref[...], w_ref[...],
                            preferred_element_type=jnp.float32)

    @pl.when(pl.program_id(2) == pl.num_programs(2) - 1)
    def _():
        y = acc_ref[...] + b_ref[...]
        if act == "relu":
            y = jnp.maximum(y, 0.0)
        o_ref[...] = y.astype(o_ref.dtype)


def matmul_bias_act(x, w, bias, act="none", out_dtype=jnp.bfloat16):
    """out = act(x @ w + bias).  x:[M,K], w:[K,N] bf16 on the MXU, bias f32.

    Tiles always divide M and N exactly (or use the full extent), so there is
    no activation padding / slicing HBM round-trip.
    """
    M, K = x.shape
    Kw, N = w.shape
    assert K == Kw, (K, Kw)
    x = x.astype(jnp.bfloat16)
    w = w.astype(jnp.bfloat16)
    b = bias.reshape(1, N).astype(jnp.float32)

    if N % 256 == 0:
        tn = 256
    elif N % 128 == 0:
        tn = 128
    else:
        tn = N                                   # full extent (lane-sparse)
    tm_target = 512 if tn <= 128 else 256        # bigger tm when N is narrow
    tm = M if M <= tm_target else _pick_tile(M, tm_target, 16)

    if K <= 2048:
        # Single full-extent K block: no K padding, no scratch.
        return pl.pallas_call(
            functools.partial(_mm_kernel_single, act=act),
            out_shape=jax.ShapeDtypeStruct((M, N), out_dtype),
            grid=(M // tm, N // tn),
            in_specs=[
                pl.BlockSpec((tm, K), lambda i, j: (i, 0)),
                pl.BlockSpec((K, tn), lambda i, j: (0, j)),
                pl.BlockSpec((1, tn), lambda i, j: (0, j)),
            ],
            out_specs=pl.BlockSpec((tm, tn), lambda i, j: (i, j)),
            compiler_params=pltpu.CompilerParams(
                dimension_semantics=("parallel", "parallel"),
                vmem_limit_bytes=VMEM_LIMIT),
        )(x, w, b)

    # Large-K fallback (never hit by this block): K-grid with f32 scratch.
    tk = 1024
    Kp = _round_up(K, tk)
    if Kp != K:
        x = jnp.pad(x, ((0, 0), (0, Kp - K)))
        w = jnp.pad(w, ((0, Kp - K), (0, 0)))
    return pl.pallas_call(
        functools.partial(_mm_kernel_multi, act=act),
        out_shape=jax.ShapeDtypeStruct((M, N), out_dtype),
        grid=(M // tm, N // tn, Kp // tk),
        in_specs=[
            pl.BlockSpec((tm, tk), lambda i, j, k: (i, k)),
            pl.BlockSpec((tk, tn), lambda i, j, k: (k, j)),
            pl.BlockSpec((1, tn), lambda i, j, k: (0, j)),
        ],
        out_specs=pl.BlockSpec((tm, tn), lambda i, j, k: (i, j)),
        scratch_shapes=[pltpu.VMEM((tm, tn), jnp.float32)],
        compiler_params=pltpu.CompilerParams(
            dimension_semantics=("parallel", "parallel", "arbitrary"),
            vmem_limit_bytes=VMEM_LIMIT),
    )(x, w, b)


# ----------------------------------------------------------------------------
# direct 3x3 conv kernel (padding=1, stride 1 or 2) — no im2col
# ----------------------------------------------------------------------------
def _conv_taps_kernel(*refs, taps, wo, act):
    """refs = (src_0..src_{S-1}, w_ref, b_ref, o_ref).

    Each src block is one padded input row [1,1,Wi,C]; `taps` is a static list
    of (src_index, column_offset) per weight tap; the kernel accumulates the
    kh*kw shifted [Wo,C] x [C,N] matmuls in f32 and applies bias + activation.
    """
    n_src = len(refs) - 3
    srcs = refs[:n_src]
    w_ref, b_ref, o_ref = refs[n_src], refs[n_src + 1], refs[n_src + 2]

    rows = [srcs[k][0, 0] for k in range(n_src)]          # each [Wi, C] bf16
    acc = None
    for t, (si, co) in enumerate(taps):
        win = rows[si][co:co + wo, :]                     # static sublane slice
        p = jnp.dot(win, w_ref[t], preferred_element_type=jnp.float32)
        acc = p if acc is None else acc + p
    y = acc + b_ref[...]
    if act == "relu":
        y = jnp.maximum(y, 0.0)
    o_ref[0, 0] = y.astype(o_ref.dtype)


def conv3x3_direct(x, w_taps, bias, stride, act="relu", out_dtype=jnp.bfloat16):
    """3x3 conv, padding=1, stride in {1,2}, NHWC, BN already folded.

    x: [B,H,W,C] bf16, w_taps: [9,C,N] bf16 (tap-major), bias: [N] f32.
    The shifted receptive-field rows are fed as separate refs with H-offset
    index maps; for stride 2 the padded input is parity-split along W (one
    small XLA pass) so all in-kernel reads stay contiguous.
    """
    B, H, W, C = x.shape
    nt, Cw, N = w_taps.shape
    assert nt == 9 and Cw == C, (w_taps.shape, C)
    Ho = (H - 1) // stride + 1
    Wo = (W - 1) // stride + 1
    xp = jnp.pad(x, ((0, 0), (1, 1), (1, 1), (0, 0)))     # spatial zero-pad

    if stride == 1:
        srcs = [xp, xp, xp]
        src_d = [0, 1, 2]
        taps = [(di, dj) for di in range(3) for dj in range(3)]
    else:
        assert stride == 2 and H % 2 == 0 and W % 2 == 0
        x_ev = xp[:, :, 0::2, :]
        x_od = xp[:, :, 1::2, :]
        srcs, src_d = [], []
        for di in range(3):
            srcs += [x_ev, x_od]
            src_d += [di, di]
        taps = [(2 * di + (dj % 2), dj // 2)
                for di in range(3) for dj in range(3)]

    b2d = bias.reshape(1, N).astype(jnp.float32)
    in_specs = [
        pl.BlockSpec((1, 1, s.shape[2], C),
                     lambda b, i, d=d, st=stride: (b, st * i + d, 0, 0))
        for s, d in zip(srcs, src_d)
    ] + [
        pl.BlockSpec((9, C, N), lambda b, i: (0, 0, 0)),
        pl.BlockSpec((1, N), lambda b, i: (0, 0)),
    ]
    return pl.pallas_call(
        functools.partial(_conv_taps_kernel, taps=tuple(taps), wo=Wo, act=act),
        out_shape=jax.ShapeDtypeStruct((B, Ho, Wo, N), out_dtype),
        grid=(B, Ho),
        in_specs=in_specs,
        out_specs=pl.BlockSpec((1, 1, Wo, N), lambda b, i: (b, i, 0, 0)),
        compiler_params=pltpu.CompilerParams(
            dimension_semantics=("parallel", "parallel"),
            vmem_limit_bytes=VMEM_LIMIT),
    )(*srcs, w_taps, b2d)


# ----------------------------------------------------------------------------
# SE block: fused GAP + fc1 + (Dropout=id) + fc2 + sigmoid
# ----------------------------------------------------------------------------
def _gap_se_kernel(x_ref, w1_ref, b1_ref, w2_ref, b2_ref, o_ref, acc_ref, *,
                   inv_hw):
    t = pl.program_id(0)

    @pl.when(t == 0)
    def _():
        acc_ref[...] = jnp.zeros_like(acc_ref)

    acc_ref[...] += jnp.sum(x_ref[...].astype(jnp.float32), axis=1)

    @pl.when(t == pl.num_programs(0) - 1)
    def _():
        g = acc_ref[...] * inv_hw                                   # [B, C]
        # NOTE: the reference SEBlock has NO ReLU between the two Linears.
        h = jnp.dot(g.astype(jnp.bfloat16), w1_ref[...],
                    preferred_element_type=jnp.float32) + b1_ref[...]
        s = jnp.dot(h.astype(jnp.bfloat16), w2_ref[...],
                    preferred_element_type=jnp.float32) + b2_ref[...]
        o_ref[...] = jax.nn.sigmoid(s)


def se_gap_fc(x_nhwc, p):
    """SEBlock channel weights: [B, C] = sigmoid(fc2(fc1(GAP(x))))."""
    B, H, W, C = x_nhwc.shape
    HW = H * W
    cred = p["w1"].shape[1]
    rt = _pick_tile(HW, 1024, 16)
    x = x_nhwc.reshape(B, HW, C)
    return pl.pallas_call(
        functools.partial(_gap_se_kernel, inv_hw=1.0 / HW),
        out_shape=jax.ShapeDtypeStruct((B, C), jnp.float32),
        grid=(HW // rt,),
        in_specs=[
            pl.BlockSpec((B, rt, C), lambda t: (0, t, 0)),
            pl.BlockSpec((C, cred), lambda t: (0, 0)),
            pl.BlockSpec((1, cred), lambda t: (0, 0)),
            pl.BlockSpec((cred, C), lambda t: (0, 0)),
            pl.BlockSpec((1, C), lambda t: (0, 0)),
        ],
        out_specs=pl.BlockSpec((B, C), lambda t: (0, 0)),
        scratch_shapes=[pltpu.VMEM((B, C), jnp.float32)],
        compiler_params=pltpu.CompilerParams(
            dimension_semantics=("arbitrary",),
            vmem_limit_bytes=VMEM_LIMIT),
    )(x, p["w1"], p["b1"], p["w2"], p["b2"])


# ----------------------------------------------------------------------------
# SE-scale + residual add + ReLU epilogue
# ----------------------------------------------------------------------------
def _se_res_kernel(s_ref, x_ref, w_ref, o_ref):
    y = s_ref[...].astype(jnp.float32) + w_ref[...] * x_ref[...].astype(jnp.float32)
    o_ref[...] = jnp.maximum(y, 0.0).astype(o_ref.dtype)


def se_residual_relu(shortcut_nhwc, x_nhwc, se_w, out_dtype=jnp.bfloat16):
    """relu(shortcut + se_w[:, None, None, :] * x), tiled over H*W rows."""
    B, H, W, C = x_nhwc.shape
    HW = H * W
    rt = _pick_tile(HW, 1024, 16)
    s = shortcut_nhwc.reshape(B, HW, C)
    x = x_nhwc.reshape(B, HW, C)
    w = se_w.reshape(B, 1, C)
    out = pl.pallas_call(
        _se_res_kernel,
        out_shape=jax.ShapeDtypeStruct((B, HW, C), out_dtype),
        grid=(HW // rt,),
        in_specs=[pl.BlockSpec((B, rt, C), lambda t: (0, t, 0)),
                  pl.BlockSpec((B, rt, C), lambda t: (0, t, 0)),
                  pl.BlockSpec((B, 1, C), lambda t: (0, 0, 0))],
        out_specs=pl.BlockSpec((B, rt, C), lambda t: (0, t, 0)),
        compiler_params=pltpu.CompilerParams(
            dimension_semantics=("parallel",),
            vmem_limit_bytes=VMEM_LIMIT),
    )(s, x, w)
    return out.reshape(B, H, W, C)


# ----------------------------------------------------------------------------
# forward pass
# ----------------------------------------------------------------------------
def bottleneck_forward_nhwc(x, params, stride):
    """x: [B,H,W,Cin] bf16 NHWC.  Returns [B,Ho,Wo,Cout] bf16 NHWC."""
    B, H, W, Cin = x.shape

    # ---- DownSample branch: AvgPool2d(2) (single XLA slice+add pass, no
    #      im2col expansion) -> 1x1 conv + BN (no relu).
    if stride == 2:
        # AvgPool2d(2,2) equivalence requires even spatial dims.
        assert H % 2 == 0 and W % 2 == 0
        p = (x[:, 0::2, 0::2].astype(jnp.float32) +
             x[:, 0::2, 1::2].astype(jnp.float32) +
             x[:, 1::2, 0::2].astype(jnp.float32) +
             x[:, 1::2, 1::2].astype(jnp.float32)) * 0.25
        p = p.astype(jnp.bfloat16)
        Ho, Wo = H // 2, W // 2
    else:
        p = x
        Ho, Wo = H, W
    d = params["down"]
    shortcut = matmul_bias_act(p.reshape(B * Ho * Wo, Cin), d["w"], d["b"],
                               act="none")
    shortcut = shortcut.reshape(B, Ho, Wo, -1)

    # ---- conv1 (1x1) + BN + ReLU.  Output channels are zero-padded to a
    #      128-lane multiple (weights padded at prep time; stays padded
    #      through conv2/conv3, never sliced back).
    # TODO(synk): ODConv2d (omni-dimensional dynamic conv) source not provided;
    #             implemented as a static 1x1 conv of the same shape.
    c1 = params["c1"]
    h = matmul_bias_act(x.reshape(B * H * W, Cin), c1["w"], c1["b"], act="relu")
    h = h.reshape(B, H, W, -1)

    # ---- conv2 (3x3, stride) + BN + ReLU — direct conv, no im2col.
    c2 = params["c2"]
    h = conv3x3_direct(h, c2["w"], c2["b"], stride, act="relu")

    # ---- conv3 (1x1) + BN (no relu)
    c3 = params["c3"]
    h = matmul_bias_act(h.reshape(B * Ho * Wo, h.shape[-1]), c3["w"], c3["b"],
                        act="none")
    h = h.reshape(B, Ho, Wo, -1)

    # TODO(synk): CoordAtt source not provided; substituted with identity.

    # ---- SE channel weights, then relu(shortcut + se_w * h)
    se_w = se_gap_fc(h, params["se"])                                # [B, C]
    return se_residual_relu(shortcut, h, se_w)


def bottleneck_forward(x_nchw, params, stride):
    """BottleNeckBlock.forward (eval mode).  NCHW in / NCHW f32 out."""
    x = jnp.transpose(x_nchw, (0, 2, 3, 1)).astype(jnp.bfloat16)     # -> NHWC
    y = bottleneck_forward_nhwc(x, params, stride)
    return jnp.transpose(y, (0, 3, 1, 2)).astype(jnp.float32)        # -> NCHW


# ----------------------------------------------------------------------------
# deterministic parameter init + prep (BN folding, channel padding, bf16)
# ----------------------------------------------------------------------------
class KeyGen:
    def __init__(self, key):
        self._key = key

    def __call__(self):
        self._key, sub = jax.random.split(self._key)
        return sub


def _conv_w(kg, kh, kw, cin, cout):
    fan_in = kh * kw * cin
    return jax.random.normal(kg(), (kh, kw, cin, cout), jnp.float32) * (2.0 / fan_in) ** 0.5


def _bn(c):
    # PyTorch BatchNorm2d defaults: gamma=1, beta=0, running mean=0, var=1.
    return dict(gamma=jnp.ones((c,), jnp.float32), beta=jnp.zeros((c,), jnp.float32),
                mean=jnp.zeros((c,), jnp.float32), var=jnp.ones((c,), jnp.float32))


def _linear_p(kg, cin, cout):
    lim = 1.0 / cin ** 0.5
    w = jax.random.uniform(kg(), (cin, cout), jnp.float32, -lim, lim)
    b = jax.random.uniform(kg(), (cout,), jnp.float32, -lim, lim)
    return w, b


def init_raw_params(key, cin, cmid, se_ratio):
    kg = KeyGen(key)
    cout = cmid * 4
    cred = int(cout * se_ratio)
    w1, b1 = _linear_p(kg, cout, cred)
    w2, b2 = _linear_p(kg, cred, cout)
    return dict(
        down_w=_conv_w(kg, 1, 1, cin, cout), down_bn=_bn(cout),
        conv1_w=_conv_w(kg, 1, 1, cin, cmid), bn1=_bn(cmid),
        conv2_w=_conv_w(kg, 3, 3, cmid, cmid), bn2=_bn(cmid),
        conv3_w=_conv_w(kg, 1, 1, cmid, cout), bn3=_bn(cout),
        se_w1=w1, se_b1=b1, se_w2=w2, se_b2=b2,
    )


def _fold_bn(w_hwio, bn):
    """Fold BatchNorm (eval) into the conv weight/bias (f32)."""
    scale = bn["gamma"] / jnp.sqrt(bn["var"] + EPS)
    bias = bn["beta"] - bn["mean"] * scale
    return w_hwio * scale[None, None, None, :], bias


def _pad_axis(a, size, axis):
    pad = size - a.shape[axis]
    if pad == 0:
        return a
    widths = [(0, 0)] * a.ndim
    widths[axis] = (0, pad)
    return jnp.pad(a, widths)


def prepare_params(raw, stride):
    del stride  # pooling handled in XLA, nothing stride-specific to fold here
    cin = raw["conv1_w"].shape[2]
    cmid = raw["conv1_w"].shape[3]
    cout = raw["conv3_w"].shape[3]
    cmid_p = _round_up(cmid, 128)     # keep intermediate channels lane-dense

    dw, db = _fold_bn(raw["down_w"], raw["down_bn"])
    dw = dw.reshape(cin, cout)

    w1, b1 = _fold_bn(raw["conv1_w"], raw["bn1"])
    w1 = _pad_axis(w1.reshape(cin, cmid), cmid_p, 1)
    b1 = _pad_axis(b1, cmid_p, 0)

    w2, b2 = _fold_bn(raw["conv2_w"], raw["bn2"])
    w2 = _pad_axis(_pad_axis(w2, cmid_p, 2), cmid_p, 3).reshape(9, cmid_p, cmid_p)
    b2 = _pad_axis(b2, cmid_p, 0)

    w3, b3 = _fold_bn(raw["conv3_w"], raw["bn3"])
    w3 = _pad_axis(w3.reshape(cmid, cout), cmid_p, 0)

    cred = raw["se_w1"].shape[1]
    return dict(
        down=dict(w=dw.astype(jnp.bfloat16), b=db.astype(jnp.float32)),
        c1=dict(w=w1.astype(jnp.bfloat16), b=b1.astype(jnp.float32)),
        c2=dict(w=w2.astype(jnp.bfloat16), b=b2.astype(jnp.float32)),
        c3=dict(w=w3.astype(jnp.bfloat16), b=b3.astype(jnp.float32)),
        se=dict(w1=raw["se_w1"].astype(jnp.bfloat16),
                b1=raw["se_b1"].reshape(1, cred).astype(jnp.float32),
                w2=raw["se_w2"].astype(jnp.bfloat16),
                b2=raw["se_b2"].reshape(1, cout).astype(jnp.float32)),
    )


# ----------------------------------------------------------------------------
if __name__ == "__main__":
    # Small shapes consistent with one BottleNeckBlock:
    # channel_input=64, channel_intermediate=32 -> channel_output=128, stride=2.
    B, CIN, H, W = 2, 64, 16, 16
    CMID, STRIDE, SE_RATIO = 32, 2, 0.25

    key = jax.random.PRNGKey(0)
    pkey, xkey = jax.random.split(key)
    raw = init_raw_params(pkey, CIN, CMID, SE_RATIO)
    params = prepare_params(raw, STRIDE)

    x = jax.random.normal(xkey, (B, CIN, H, W), jnp.float32)   # NCHW like PyTorch

    fwd = jax.jit(functools.partial(bottleneck_forward, stride=STRIDE))
    out = fwd(x, params)
    jax.block_until_ready(out)

    assert out.shape == (B, CMID * 4, H // STRIDE, W // STRIDE), out.shape
    assert bool(jnp.all(jnp.isfinite(out)))
    print("KERNEL_OK")
</pallas_src>

<mosaic_0001>
module attributes {stable_mosaic.version = 11 : i64} {
  func.func @_mm_kernel_single(%arg0: i32, %arg1: i32, %arg2: memref<128x64xbf16, #tpu.memory_space<vmem>>, %arg3: memref<64x128xbf16, #tpu.memory_space<vmem>>, %arg4: memref<1x128xf32, #tpu.memory_space<vmem>>, %arg5: memref<128x128xbf16, #tpu.memory_space<vmem>>) attributes {dimension_semantics = [#tpu.dimension_semantics<parallel>, #tpu.dimension_semantics<parallel>], iteration_bounds = array<i64: 1, 1>, scalar_prefetch = 0 : i64, scratch_operands = 0 : i64, tpu.core_type = #tpu.core_type<tc>, window_params = [{transform_indices = @transform_0, window_bounds = array<i64: 128, 64>}, {transform_indices = @transform_1, window_bounds = array<i64: 64, 128>}, {transform_indices = @transform_2, window_bounds = array<i64: 1, 128>}, {transform_indices = @transform_3, window_bounds = array<i64: 128, 128>}]} {
    %c0 = arith.constant 0 : index
    %c0_0 = arith.constant 0 : index
    %0 = vector.load %arg2[%c0, %c0_0] : memref<128x64xbf16, #tpu.memory_space<vmem>>, vector<128x64xbf16>
    %c0_1 = arith.constant 0 : index
    %c0_2 = arith.constant 0 : index
    %1 = vector.load %arg3[%c0_1, %c0_2] : memref<64x128xbf16, #tpu.memory_space<vmem>>, vector<64x128xbf16>
    %cst = arith.constant dense<0.000000e+00> : vector<128x128xf32>
    %2 = tpu.matmul %0, %1, %cst {dimension_numbers = #tpu.dot_dimension_numbers<[1], [0], [0], [1], [0, 0, 1, 1], [], []>} : vector<128x64xbf16>, vector<64x128xbf16>, vector<128x128xf32> -> vector<128x128xf32>
    %c0_3 = arith.constant 0 : index
    %c0_4 = arith.constant 0 : index
    %3 = vector.load %arg4[%c0_3, %c0_4] : memref<1x128xf32, #tpu.memory_space<vmem>>, vector<1x128xf32>
    %4 = vector.broadcast %3 : vector<1x128xf32> to vector<128x128xf32>
    %5 = arith.addf %2, %4 : vector<128x128xf32>
    %6 = arith.truncf %5 : vector<128x128xf32> to vector<128x128xbf16>
    %c0_5 = arith.constant 0 : index
    %c0_6 = arith.constant 0 : index
    %7 = vector.load %arg5[%c0_5, %c0_6] : memref<128x128xbf16, #tpu.memory_space<vmem>>, vector<128x128xbf16>
    tpu.vector_store %arg5[%c0_5, %c0_6], %6 {strides = array<i32>} : memref<128x128xbf16, #tpu.memory_space<vmem>>, vector<128x128xbf16>,
    return
  }
  func.func @transform_0(%arg0: i32, %arg1: i32) -> (i32, i32) {
    %c0_i32 = arith.constant 0 : i32
    %c0_i32_0 = arith.constant 0 : i32
    return %arg0, %c0_i32 : i32, i32
  }
  func.func @transform_1(%arg0: i32, %arg1: i32) -> (i32, i32) {
    %c0_i32 = arith.constant 0 : i32
    %c0_i32_0 = arith.constant 0 : i32
    return %c0_i32, %arg1 : i32, i32
  }
  func.func @transform_2(%arg0: i32, %arg1: i32) -> (i32, i32) {
    %c0_i32 = arith.constant 0 : i32
    %c0_i32_0 = arith.constant 0 : i32
    return %c0_i32, %arg1 : i32, i32
  }
  func.func @transform_3(%arg0: i32, %arg1: i32) -> (i32, i32) {
    %c0_i32 = arith.constant 0 : i32
    return %arg0, %arg1 : i32, i32
  }
}

module attributes {stable_mosaic.version = 11 : i64} {
  func.func @_mm_kernel_single(%arg0: i32, %arg1: i32, %arg2: memref<512x64xbf16, #tpu.memory_space<vmem>>, %arg3: memref<64x128xbf16, #tpu.memory_space<vmem>>, %arg4: memref<1x128xf32, #tpu.memory_space<vmem>>, %arg5: memref<512x128xbf16, #tpu.memory_space<vmem>>) attributes {dimension_semantics = [#tpu.dimension_semantics<parallel>, #tpu.dimension_semantics<parallel>], iteration_bounds = array<i64: 1, 1>, scalar_prefetch = 0 : i64, scratch_operands = 0 : i64, tpu.core_type = #tpu.core_type<tc>, window_params = [{transform_indices = @transform_0, window_bounds = array<i64: 512, 64>}, {transform_indices = @transform_1, window_bounds = array<i64: 64, 128>}, {transform_indices = @transform_2, window_bounds = array<i64: 1, 128>}, {transform_indices = @transform_3, window_bounds = array<i64: 512, 128>}]} {
    %c0 = arith.constant 0 : index
    %c0_0 = arith.constant 0 : index
    %0 = vector.load %arg2[%c0, %c0_0] : memref<512x64xbf16, #tpu.memory_space<vmem>>, vector<512x64xbf16>
    %c0_1 = arith.constant 0 : index
    %c0_2 = arith.constant 0 : index
    %1 = vector.load %arg3[%c0_1, %c0_2] : memref<64x128xbf16, #tpu.memory_space<vmem>>, vector<64x128xbf16>
    %cst = arith.constant dense<0.000000e+00> : vector<512x128xf32>
    %2 = tpu.matmul %0, %1, %cst {dimension_numbers = #tpu.dot_dimension_numbers<[1], [0], [0], [1], [0, 0, 1, 1], [], []>} : vector<512x64xbf16>, vector<64x128xbf16>, vector<512x128xf32> -> vector<512x128xf32>
    %c0_3 = arith.constant 0 : index
    %c0_4 = arith.constant 0 : index
    %3 = vector.load %arg4[%c0_3, %c0_4] : memref<1x128xf32, #tpu.memory_space<vmem>>, vector<1x128xf32>
    %4 = vector.broadcast %3 : vector<1x128xf32> to vector<512x128xf32>
    %5 = arith.addf %2, %4 : vector<512x128xf32>
    %cst_5 = arith.constant 0.000000e+00 : f32
    %6 = vector.broadcast %cst_5 : f32 to vector<512x128xf32>
    %7 = arith.maximumf %5, %6 : vector<512x128xf32>
    %8 = arith.truncf %7 : vector<512x128xf32> to vector<512x128xbf16>
    %c0_6 = arith.constant 0 : index
    %c0_7 = arith.constant 0 : index
    %9 = vector.load %arg5[%c0_6, %c0_7] : memref<512x128xbf16, #tpu.memory_space<vmem>>, vector<512x128xbf16>
    tpu.vector_store %arg5[%c0_6, %c0_7], %8 {strides = array<i32>} : memref<512x128xbf16, #tpu.memory_space<vmem>>, vector<512x128xbf16>,
    return
  }
  func.func @transform_0(%arg0: i32, %arg1: i32) -> (i32, i32) {
    %c0_i32 = arith.constant 0 : i32
    %c0_i32_0 = arith.constant 0 : i32
    return %arg0, %c0_i32 : i32, i32
  }
  func.func @transform_1(%arg0: i32, %arg1: i32) -> (i32, i32) {
    %c0_i32 = arith.constant 0 : i32
    %c0_i32_0 = arith.constant 0 : i32
    return %c0_i32, %arg1 : i32, i32
  }
  func.func @transform_2(%arg0: i32, %arg1: i32) -> (i32, i32) {
    %c0_i32 = arith.constant 0 : i32
    %c0_i32_0 = arith.constant 0 : i32
    return %c0_i32, %arg1 : i32, i32
  }
  func.func @transform_3(%arg0: i32, %arg1: i32) -> (i32, i32) {
    %c0_i32 = arith.constant 0 : i32
    return %arg0, %arg1 : i32, i32
  }
}

module attributes {stable_mosaic.version = 11 : i64} {
  func.func @_mm_kernel_single(%arg0: i32, %arg1: i32, %arg2: memref<128x128xbf16, #tpu.memory_space<vmem>>, %arg3: memref<128x128xbf16, #tpu.memory_space<vmem>>, %arg4: memref<1x128xf32, #tpu.memory_space<vmem>>, %arg5: memref<128x128xbf16, #tpu.memory_space<vmem>>) attributes {dimension_semantics = [#tpu.dimension_semantics<parallel>, #tpu.dimension_semantics<parallel>], iteration_bounds = array<i64: 1, 1>, scalar_prefetch = 0 : i64, scratch_operands = 0 : i64, tpu.core_type = #tpu.core_type<tc>, window_params = [{transform_indices = @transform_0, window_bounds = array<i64: 128, 128>}, {transform_indices = @transform_1, window_bounds = array<i64: 128, 128>}, {transform_indices = @transform_2, window_bounds = array<i64: 1, 128>}, {transform_indices = @transform_3, window_bounds = array<i64: 128, 128>}]} {
    %c0 = arith.constant 0 : index
    %c0_0 = arith.constant 0 : index
    %0 = vector.load %arg2[%c0, %c0_0] : memref<128x128xbf16, #tpu.memory_space<vmem>>, vector<128x128xbf16>
    %c0_1 = arith.constant 0 : index
    %c0_2 = arith.constant 0 : index
    %1 = vector.load %arg3[%c0_1, %c0_2] : memref<128x128xbf16, #tpu.memory_space<vmem>>, vector<128x128xbf16>
    %cst = arith.constant dense<0.000000e+00> : vector<128x128xf32>
    %2 = tpu.matmul %0, %1, %cst {dimension_numbers = #tpu.dot_dimension_numbers<[1], [0], [0], [1], [0, 0, 1, 1], [], []>} : vector<128x128xbf16>, vector<128x128xbf16>, vector<128x128xf32> -> vector<128x128xf32>
    %c0_3 = arith.constant 0 : index
    %c0_4 = arith.constant 0 : index
    %3 = vector.load %arg4[%c0_3, %c0_4] : memref<1x128xf32, #tpu.memory_space<vmem>>, vector<1x128xf32>
    %4 = vector.broadcast %3 : vector<1x128xf32> to vector<128x128xf32>
    %5 = arith.addf %2, %4 : vector<128x128xf32>
    %6 = arith.truncf %5 : vector<128x128xf32> to vector<128x128xbf16>
    %c0_5 = arith.constant 0 : index
    %c0_6 = arith.constant 0 : index
    %7 = vector.load %arg5[%c0_5, %c0_6] : memref<128x128xbf16, #tpu.memory_space<vmem>>, vector<128x128xbf16>
    tpu.vector_store %arg5[%c0_5, %c0_6], %6 {strides = array<i32>} : memref<128x128xbf16, #tpu.memory_space<vmem>>, vector<128x128xbf16>,
    return
  }
  func.func @transform_0(%arg0: i32, %arg1: i32) -> (i32, i32) {
    %c0_i32 = arith.constant 0 : i32
    %c0_i32_0 = arith.constant 0 : i32
    return %arg0, %c0_i32 : i32, i32
  }
  func.func @transform_1(%arg0: i32, %arg1: i32) -> (i32, i32) {
    %c0_i32 = arith.constant 0 : i32
    %c0_i32_0 = arith.constant 0 : i32
    return %c0_i32, %arg1 : i32, i32
  }
  func.func @transform_2(%arg0: i32, %arg1: i32) -> (i32, i32) {
    %c0_i32 = arith.constant 0 : i32
    %c0_i32_0 = arith.constant 0 : i32
    return %c0_i32, %arg1 : i32, i32
  }
  func.func @transform_3(%arg0: i32, %arg1: i32) -> (i32, i32) {
    %c0_i32 = arith.constant 0 : i32
    return %arg0, %arg1 : i32, i32
  }
}

module attributes {stable_mosaic.version = 11 : i64} {
  func.func @_conv_taps_kernel(%arg0: i32, %arg1: i32, %arg2: memref<1x1x9x128xbf16, #tpu.memory_space<vmem>>, %arg3: memref<1x1x9x128xbf16, #tpu.memory_space<vmem>>, %arg4: memref<1x1x9x128xbf16, #tpu.memory_space<vmem>>, %arg5: memref<1x1x9x128xbf16, #tpu.memory_space<vmem>>, %arg6: memref<1x1x9x128xbf16, #tpu.memory_space<vmem>>, %arg7: memref<1x1x9x128xbf16, #tpu.memory_space<vmem>>, %arg8: memref<9x128x128xbf16, #tpu.memory_space<vmem>>, %arg9: memref<1x128xf32, #tpu.memory_space<vmem>>, %arg10: memref<1x1x8x128xbf16, #tpu.memory_space<vmem>>) attributes {dimension_semantics = [#tpu.dimension_semantics<parallel>, #tpu.dimension_semantics<parallel>], iteration_bounds = array<i64: 2, 8>, scalar_prefetch = 0 : i64, scratch_operands = 0 : i64, tpu.core_type = #tpu.core_type<tc>, window_params = [{transform_indices = @transform_0, window_bounds = array<i64: 1, 1, 9, 128>}, {transform_indices = @transform_1, window_bounds = array<i64: 1, 1, 9, 128>}, {transform_indices = @transform_2, window_bounds = array<i64: 1, 1, 9, 128>}, {transform_indices = @transform_3, window_bounds = array<i64: 1, 1, 9, 128>}, {transform_indices = @transform_4, window_bounds = array<i64: 1, 1, 9, 128>}, {transform_indices = @transform_5, window_bounds = array<i64: 1, 1, 9, 128>}, {pipeline_mode = #tpu.pipeline_mode<synchronous>, transform_indices = @transform_6, window_bounds = array<i64: 9, 128, 128>}, {pipeline_mode = #tpu.pipeline_mode<synchronous>, transform_indices = @transform_7, window_bounds = array<i64: 1, 128>}, {transform_indices = @transform_8, window_bounds = array<i64: 1, 1, 8, 128>}]} {
    %c0 = arith.constant 0 : index
    %c0_0 = arith.constant 0 : index
    %c0_1 = arith.constant 0 : index
    %c0_2 = arith.constant 0 : index
    %0 = vector.load %arg2[%c0, %c0_0, %c0_1, %c0_2] : memref<1x1x9x128xbf16, #tpu.memory_space<vmem>>, vector<1x1x9x128xbf16>
    %1 = vector.shape_cast %0 : vector<1x1x9x128xbf16> to vector<9x128xbf16>
    %c0_3 = arith.constant 0 : index
    %c0_4 = arith.constant 0 : index
    %c0_5 = arith.constant 0 : index
    %c0_6 = arith.constant 0 : index
    %2 = vector.load %arg3[%c0_3, %c0_4, %c0_5, %c0_6] : memref<1x1x9x128xbf16, #tpu.memory_space<vmem>>, vector<1x1x9x128xbf16>
    %3 = vector.shape_cast %2 : vector<1x1x9x128xbf16> to vector<9x128xbf16>
    %c0_7 = arith.constant 0 : index
    %c0_8 = arith.constant 0 : index
    %c0_9 = arith.constant 0 : index
    %c0_10 = arith.constant 0 : index
    %4 = vector.load %arg4[%c0_7, %c0_8, %c0_9, %c0_10] : memref<1x1x9x128xbf16, #tpu.memory_space<vmem>>, vector<1x1x9x128xbf16>
    %5 = vector.shape_cast %4 : vector<1x1x9x128xbf16> to vector<9x128xbf16>
    %c0_11 = arith.constant 0 : index
    %c0_12 = arith.constant 0 : index
    %c0_13 = arith.constant 0 : index
    %c0_14 = arith.constant 0 : index
    %6 = vector.load %arg5[%c0_11, %c0_12, %c0_13, %c0_14] : memref<1x1x9x128xbf16, #tpu.memory_space<vmem>>, vector<1x1x9x128xbf16>
    %7 = vector.shape_cast %6 : vector<1x1x9x128xbf16> to vector<9x128xbf16>
    %c0_15 = arith.constant 0 : index
    %c0_16 = arith.constant 0 : index
    %c0_17 = arith.constant 0 : index
    %c0_18 = arith.constant 0 : index
    %8 = vector.load %arg6[%c0_15, %c0_16, %c0_17, %c0_18] : memref<1x1x9x128xbf16, #tpu.memory_space<vmem>>, vector<1x1x9x128xbf16>
    %9 = vector.shape_cast %8 : vector<1x1x9x128xbf16> to vector<9x128xbf16>
    %c0_19 = arith.constant 0 : index
    %c0_20 = arith.constant 0 : index
    %c0_21 = arith.constant 0 : index
    %c0_22 = arith.constant 0 : index
    %10 = vector.load %arg7[%c0_19, %c0_20, %c0_21, %c0_22] : memref<1x1x9x128xbf16, #tpu.memory_space<vmem>>, vector<1x1x9x128xbf16>
    %11 = vector.shape_cast %10 : vector<1x1x9x128xbf16> to vector<9x128xbf16>
    %12 = vector.extract_strided_slice %1 {offsets = [0, 0], sizes = [8, 128], strides = [1, 1]} : vector<9x128xbf16> to vector<8x128xbf16>
    %c0_23 = arith.constant 0 : index
    %c0_24 = arith.constant 0 : index
    %c0_25 = arith.constant 0 : index
    %13 = vector.load %arg8[%c0_23, %c0_24, %c0_25] : memref<9x128x128xbf16, #tpu.memory_space<vmem>>, vector<1x128x128xbf16>
    %14 = vector.shape_cast %13 : vector<1x128x128xbf16> to vector<128x128xbf16>
    %cst = arith.constant dense<0.000000e+00> : vector<8x128xf32>
    %15 = tpu.matmul %12, %14, %cst {dimension_numbers = #tpu.dot_dimension_numbers<[1], [0], [0], [1], [0, 0, 1, 1], [], []>} : vector<8x128xbf16>, vector<128x128xbf16>, vector<8x128xf32> -> vector<8x128xf32>
    %16 = vector.extract_strided_slice %3 {offsets = [0, 0], sizes = [8, 128], strides = [1, 1]} : vector<9x128xbf16> to vector<8x128xbf16>
    %c1 = arith.constant 1 : index
    %c0_26 = arith.constant 0 : index
    %c0_27 = arith.constant 0 : index
    %17 = vector.load %arg8[%c1, %c0_26, %c0_27] : memref<9x128x128xbf16, #tpu.memory_space<vmem>>, vector<1x128x128xbf16>
    %18 = vector.shape_cast %17 : vector<1x128x128xbf16> to vector<128x128xbf16>
    %cst_28 = arith.constant dense<0.000000e+00> : vector<8x128xf32>
    %19 = tpu.matmul %16, %18, %cst_28 {dimension_numbers = #tpu.dot_dimension_numbers<[1], [0], [0], [1], [0, 0, 1, 1], [], []>} : vector<8x128xbf16>, vector<128x128xbf16>, vector<8x128xf32> -> vector<8x128xf32>
    %20 = arith.addf %15, %19 : vector<8x128xf32>
    %21 = vector.extract_strided_slice %1 {offsets = [1, 0], sizes = [8, 128], strides = [1, 1]} : vector<9x128xbf16> to vector<8x128xbf16>
    %c2 = arith.constant 2 : index
    %c0_29 = arith.constant 0 : index
    %c0_30 = arith.constant 0 : index
    %22 = vector.load %arg8[%c2, %c0_29, %c0_30] : memref<9x128x128xbf16, #tpu.memory_space<vmem>>, vector<1x128x128xbf16>
    %23 = vector.shape_cast %22 : vector<1x128x128xbf16> to vector<128x128xbf16>
    %cst_31 = arith.constant dense<0.000000e+00> : vector<8x128xf32>
    %24 = tpu.matmul %21, %23, %cst_31 {dimension_numbers = #tpu.dot_dimension_numbers<[1], [0], [0], [1], [0, 0, 1, 1], [], []>} : vector<8x128xbf16>, vector<128x128xbf16>, vector<8x128xf32> -> vector<8x128xf32>
    %25 = arith.addf %20, %24 : vector<8x128xf32>
    %26 = vector.extract_strided_slice %5 {offsets = [0, 0], sizes = [8, 128], strides = [1, 1]} : vector<9x128xbf16> to vector<8x128xbf16>
    %c3 = arith.constant 3 : index
    %c0_32 = arith.constant 0 : index
    %c0_33 = arith.constant 0 : index
    %27 = vector.load %arg8[%c3, %c0_32, %c0_33] : memref<9x128x128xbf16, #tpu.memory_space<vmem>>, vector<1x128x128xbf16>
    %28 = vector.shape_cast %27 : vector<1x128x128xbf16> to vector<128x128xbf16>
    %cst_34 = arith.constant dense<0.000000e+00> : vector<8x128xf32>
    %29 = tpu.matmul %26, %28, %cst_34 {dimension_numbers = #tpu.dot_dimension_numbers<[1], [0], [0], [1], [0, 0, 1, 1], [], []>} : vector<8x128xbf16>, vector<128x128xbf16>, vector<8x128xf32> -> vector<8x128xf32>
    %30 = arith.addf %25, %29 : vector<8x128xf32>
    %31 = vector.extract_strided_slice %7 {offsets = [0, 0], sizes = [8, 128], strides = [1, 1]} : vector<9x128xbf16> to vector<8x128xbf16>
    %c4 = arith.constant 4 : index
    %c0_35 = arith.constant 0 : index
    %c0_36 = arith.constant 0 : index
    %32 = vector.load %arg8[%c4, %c0_35, %c0_36] : memref<9x128x128xbf16, #tpu.memory_space<vmem>>, vector<1x128x128xbf16>
    %33 = vector.shape_cast %32 : vector<1x128x128xbf16> to vector<128x128xbf16>
    %cst_37 = arith.constant dense<0.000000e+00> : vector<8x128xf32>
    %34 = tpu.matmul %31, %33, %cst_37 {dimension_numbers = #tpu.dot_dimension_numbers<[1], [0], [0], [1], [0, 0, 1, 1], [], []>} : vector<8x128xbf16>, vector<128x128xbf16>, vector<8x128xf32> -> vector<8x128xf32>
    %35 = arith.addf %30, %34 : vector<8x128xf32>
    %36 = vector.extract_strided_slice %5 {offsets = [1, 0], sizes = [8, 128], strides = [1, 1]} : vector<9x128xbf16> to vector<8x128xbf16>
    %c5 = arith.constant 5 : index
    %c0_38 = arith.constant 0 : index
    %c0_39 = arith.constant 0 : index
    %37 = vector.load %arg8[%c5, %c0_38, %c0_39] : memref<9x128x128xbf16, #tpu.memory_space<vmem>>, vector<1x128x128xbf16>
    %38 = vector.shape_cast %37 : vector<1x128x128xbf16> to vector<128x128xbf16>
    %cst_40 = arith.constant dense<0.000000e+00> : vector<8x128xf32>
    %39 = tpu.matmul %36, %38, %cst_40 {dimension_numbers = #tpu.dot_dimension_numbers<[1], [0], [0], [1], [0, 0, 1, 1], [], []>} : vector<8x128xbf16>, vector<128x128xbf16>, vector<8x128xf32> -> vector<8x128xf32>
    %40 = arith.addf %35, %39 : vector<8x128xf32>
    %41 = vector.extract_strided_slice %9 {offsets = [0, 0], sizes = [8, 128], strides = [1, 1]} : vector<9x128xbf16> to vector<8x128xbf16>
    %c6 = arith.constant 6 : index
    %c0_41 = arith.constant 0 : index
    %c0_42 = arith.constant 0 : index
    %42 = vector.load %arg8[%c6, %c0_41, %c0_42] : memref<9x128x128xbf16, #tpu.memory_space<vmem>>, vector<1x128x128xbf16>
    %43 = vector.shape_cast %42 : vector<1x128x128xbf16> to vector<128x128xbf16>
    %cst_43 = arith.constant dense<0.000000e+00> : vector<8x128xf32>
    %44 = tpu.matmul %41, %43, %cst_43 {dimension_numbers = #tpu.dot_dimension_numbers<[1], [0], [0], [1], [0, 0, 1, 1], [], []>} : vector<8x128xbf16>, vector<128x128xbf16>, vector<8x128xf32> -> vector<8x128xf32>
    %45 = arith.addf %40, %44 : vector<8x128xf32>
    %46 = vector.extract_strided_slice %11 {offsets = [0, 0], sizes = [8, 128], strides = [1, 1]} : vector<9x128xbf16> to vector<8x128xbf16>
    %c7 = arith.constant 7 : index
    %c0_44 = arith.constant 0 : index
    %c0_45 = arith.constant 0 : index
    %47 = vector.load %arg8[%c7, %c0_44, %c0_45] : memref<9x128x128xbf16, #tpu.memory_space<vmem>>, vector<1x128x128xbf16>
    %48 = vector.shape_cast %47 : vector<1x128x128xbf16> to vector<128x128xbf16>
    %cst_46 = arith.constant dense<0.000000e+00> : vector<8x128xf32>
    %49 = tpu.matmul %46, %48, %cst_46 {dimension_numbers = #tpu.dot_dimension_numbers<[1], [0], [0], [1], [0, 0, 1, 1], [], []>} : vector<8x128xbf16>, vector<128x128xbf16>, vector<8x128xf32> -> vector<8x128xf32>
    %50 = arith.addf %45, %49 : vector<8x128xf32>
    %51 = vector.extract_strided_slice %9 {offsets = [1, 0], sizes = [8, 128], strides = [1, 1]} : vector<9x128xbf16> to vector<8x128xbf16>
    %c8 = arith.constant 8 : index
    %c0_47 = arith.constant 0 : index
    %c0_48 = arith.constant 0 : index
    %52 = vector.load %arg8[%c8, %c0_47, %c0_48] : memref<9x128x128xbf16, #tpu.memory_space<vmem>>, vector<1x128x128xbf16>
    %53 = vector.shape_cast %52 : vector<1x128x128xbf16> to vector<128x128xbf16>
    %cst_49 = arith.constant dense<0.000000e+00> : vector<8x128xf32>
    %54 = tpu.matmul %51, %53, %cst_49 {dimension_numbers = #tpu.dot_dimension_numbers<[1], [0], [0], [1], [0, 0, 1, 1], [], []>} : vector<8x128xbf16>, vector<128x128xbf16>, vector<8x128xf32> -> vector<8x128xf32>
    %55 = arith.addf %50, %54 : vector<8x128xf32>
    %c0_50 = arith.constant 0 : index
    %c0_51 = arith.constant 0 : index
    %56 = vector.load %arg9[%c0_50, %c0_51] : memref<1x128xf32, #tpu.memory_space<vmem>>, vector<1x128xf32>
    %57 = vector.broadcast %56 : vector<1x128xf32> to vector<8x128xf32>
    %58 = arith.addf %55, %57 : vector<8x128xf32>
    %cst_52 = arith.constant 0.000000e+00 : f32
    %59 = vector.broadcast %cst_52 : f32 to vector<8x128xf32>
    %60 = arith.maximumf %58, %59 : vector<8x128xf32>
    %61 = arith.truncf %60 : vector<8x128xf32> to vector<8x128xbf16>
    %c0_53 = arith.constant 0 : index
    %c0_54 = arith.constant 0 : index
    %c0_55 = arith.constant 0 : index
    %c0_56 = arith.constant 0 : index
    %62 = vector.load %arg10[%c0_53, %c0_54, %c0_55, %c0_56] : memref<1x1x8x128xbf16, #tpu.memory_space<vmem>>, vector<1x1x8x128xbf16>
    %63 = vector.shape_cast %62 : vector<1x1x8x128xbf16> to vector<8x128xbf16>
    %64 = vector.shape_cast %61 : vector<8x128xbf16> to vector<1x1x8x128xbf16>
    tpu.vector_store %arg10[%c0_53, %c0_54, %c0_55, %c0_56], %64 {strides = array<i32>} : memref<1x1x8x128xbf16, #tpu.memory_space<vmem>>, vector<1x1x8x128xbf16>,
    return
  }
  func.func @transform_0(%arg0: i32, %arg1: i32) -> (i32, i32, i32, i32) {
    %c2_i32 = arith.constant 2 : i32
    %0 = arith.muli %c2_i32, %arg1 : i32
    %c0_i32 = arith.constant 0 : i32
    %1 = arith.addi %0, %c0_i32 : i32
    %c0_i32_0 = arith.constant 0 : i32
    %c0_i32_1 = arith.constant 0 : i32
    %c0_i32_2 = arith.constant 0 : i32
    return %arg0, %1, %c0_i32_0, %c0_i32_1 : i32, i32, i32, i32
  }
  func.func @transform_1(%arg0: i32, %arg1: i32) -> (i32, i32, i32, i32) {
    %c2_i32 = arith.constant 2 : i32
    %0 = arith.muli %c2_i32, %arg1 : i32
    %c0_i32 = arith.constant 0 : i32
    %1 = arith.addi %0, %c0_i32 : i32
    %c0_i32_0 = arith.constant 0 : i32
    %c0_i32_1 = arith.constant 0 : i32
    %c0_i32_2 = arith.constant 0 : i32
    return %arg0, %1, %c0_i32_0, %c0_i32_1 : i32, i32, i32, i32
  }
  func.func @transform_2(%arg0: i32, %arg1: i32) -> (i32, i32, i32, i32) {
    %c2_i32 = arith.constant 2 : i32
    %0 = arith.muli %c2_i32, %arg1 : i32
    %c1_i32 = arith.constant 1 : i32
    %1 = arith.addi %0, %c1_i32 : i32
    %c0_i32 = arith.constant 0 : i32
    %c0_i32_0 = arith.constant 0 : i32
    %c0_i32_1 = arith.constant 0 : i32
    return %arg0, %1, %c0_i32, %c0_i32_0 : i32, i32, i32, i32
  }
  func.func @transform_3(%arg0: i32, %arg1: i32) -> (i32, i32, i32, i32) {
    %c2_i32 = arith.constant 2 : i32
    %0 = arith.muli %c2_i32, %arg1 : i32
    %c1_i32 = arith.constant 1 : i32
    %1 = arith.addi %0, %c1_i32 : i32
    %c0_i32 = arith.constant 0 : i32
    %c0_i32_0 = arith.constant 0 : i32
    %c0_i32_1 = arith.constant 0 : i32
    return %arg0, %1, %c0_i32, %c0_i32_0 : i32, i32, i32, i32
  }
  func.func @transform_4(%arg0: i32, %arg1: i32) -> (i32, i32, i32, i32) {
    %c2_i32 = arith.constant 2 : i32
    %0 = arith.muli %c2_i32, %arg1 : i32
    %c2_i32_0 = arith.constant 2 : i32
    %1 = arith.addi %0, %c2_i32_0 : i32
    %c0_i32 = arith.constant 0 : i32
    %c0_i32_1 = arith.constant 0 : i32
    %c0_i32_2 = arith.constant 0 : i32
    return %arg0, %1, %c0_i32, %c0_i32_1 : i32, i32, i32, i32
  }
  func.func @transform_5(%arg0: i32, %arg1: i32) -> (i32, i32, i32, i32) {
    %c2_i32 = arith.constant 2 : i32
    %0 = arith.muli %c2_i32, %arg1 : i32
    %c2_i32_0 = arith.constant 2 : i32
    %1 = arith.addi %0, %c2_i32_0 : i32
    %c0_i32 = arith.constant 0 : i32
    %c0_i32_1 = arith.constant 0 : i32
    %c0_i32_2 = arith.constant 0 : i32
    return %arg0, %1, %c0_i32, %c0_i32_1 : i32, i32, i32, i32
  }
  func.func @transform_6(%arg0: i32, %arg1: i32) -> (i32, i32, i32) {
    %c0_i32 = arith.constant 0 : i32
    %c0_i32_0 = arith.constant 0 : i32
    %c0_i32_1 = arith.constant 0 : i32
    %c0_i32_2 = arith.constant 0 : i32
    return %c0_i32, %c0_i32_0, %c0_i32_1 : i32, i32, i32
  }
  func.func @transform_7(%arg0: i32, %arg1: i32) -> (i32, i32) {
    %c0_i32 = arith.constant 0 : i32
    %c0_i32_0 = arith.constant 0 : i32
    %c0_i32_1 = arith.constant 0 : i32
    return %c0_i32, %c0_i32_0 : i32, i32
  }
  func.func @transform_8(%arg0: i32, %arg1: i32) -> (i32, i32, i32, i32) {
    %c0_i32 = arith.constant 0 : i32
    %c0_i32_0 = arith.constant 0 : i32
    %c0_i32_1 = arith.constant 0 : i32
    return %arg0, %arg1, %c0_i32, %c0_i32_0 : i32, i32, i32, i32
  }
}

module attributes {stable_mosaic.version = 11 : i64} {
  func.func @_gap_se_kernel(%arg0: i32, %arg1: memref<2x64x128xbf16, #tpu.memory_space<vmem>>, %arg2: memref<128x32xbf16, #tpu.memory_space<vmem>>, %arg3: memref<1x32xf32, #tpu.memory_space<vmem>>, %arg4: memref<32x128xbf16, #tpu.memory_space<vmem>>, %arg5: memref<1x128xf32, #tpu.memory_space<vmem>>, %arg6: memref<2x128xf32, #tpu.memory_space<vmem>>, %arg7: memref<2x128xf32, #tpu.memory_space<vmem>>) attributes {dimension_semantics = [#tpu.dimension_semantics<arbitrary>], iteration_bounds = array<i64: 1>, scalar_prefetch = 0 : i64, scratch_operands = 1 : i64, tpu.core_type = #tpu.core_type<tc>, window_params = [{transform_indices = @transform_0, window_bounds = array<i64: 2, 64, 128>}, {pipeline_mode = #tpu.pipeline_mode<synchronous>, transform_indices = @transform_1, window_bounds = array<i64: 128, 32>}, {pipeline_mode = #tpu.pipeline_mode<synchronous>, transform_indices = @transform_2, window_bounds = array<i64: 1, 32>}, {pipeline_mode = #tpu.pipeline_mode<synchronous>, transform_indices = @transform_3, window_bounds = array<i64: 32, 128>}, {pipeline_mode = #tpu.pipeline_mode<synchronous>, transform_indices = @transform_4, window_bounds = array<i64: 1, 128>}, {pipeline_mode = #tpu.pipeline_mode<synchronous>, transform_indices = @transform_5, window_bounds = array<i64: 2, 128>}]} {
    %c0_i32 = arith.constant 0 : i32
    %0 = arith.cmpi eq, %arg0, %c0_i32 : i32
    %1 = arith.extui %0 : i1 to i32
    %c0_i32_0 = arith.constant 0 : i32
    %2 = arith.cmpi ne, %1, %c0_i32_0 : i32
    scf.if %2 {
      %cst_9 = arith.constant 0.000000e+00 : f32
      %12 = vector.broadcast %cst_9 : f32 to vector<2x128xf32>
      %c0_10 = arith.constant 0 : index
      %c0_11 = arith.constant 0 : index
      %13 = vector.load %arg7[%c0_10, %c0_11] : memref<2x128xf32, #tpu.memory_space<vmem>>, vector<2x128xf32>
      tpu.vector_store %arg7[%c0_10, %c0_11], %12 {strides = array<i32>} : memref<2x128xf32, #tpu.memory_space<vmem>>, vector<2x128xf32>,
    } else {
    }
    %c0 = arith.constant 0 : index
    %c0_1 = arith.constant 0 : index
    %3 = vector.load %arg7[%c0, %c0_1] : memref<2x128xf32, #tpu.memory_space<vmem>>, vector<2x128xf32>
    %c0_2 = arith.constant 0 : index
    %c0_3 = arith.constant 0 : index
    %c0_4 = arith.constant 0 : index
    %4 = vector.load %arg1[%c0_2, %c0_3, %c0_4] : memref<2x64x128xbf16, #tpu.memory_space<vmem>>, vector<2x64x128xbf16>
    %5 = arith.extf %4 : vector<2x64x128xbf16> to vector<2x64x128xf32>
    %cst = arith.constant dense<0.000000e+00> : vector<2x128xf32>
    %6 = vector.multi_reduction <add>, %5, %cst [1] : vector<2x64x128xf32> to vector<2x128xf32>
    %7 = arith.addf %3, %6 : vector<2x128xf32>
    %c0_5 = arith.constant 0 : index
    %c0_6 = arith.constant 0 : index
    %8 = vector.load %arg7[%c0_5, %c0_6] : memref<2x128xf32, #tpu.memory_space<vmem>>, vector<2x128xf32>
    tpu.vector_store %arg7[%c0_5, %c0_6], %7 {strides = array<i32>} : memref<2x128xf32, #tpu.memory_space<vmem>>, vector<2x128xf32>,
    %c0_i32_7 = arith.constant 0 : i32
    %9 = arith.cmpi eq, %arg0, %c0_i32_7 : i32
    %10 = arith.extui %9 : i1 to i32
    %c0_i32_8 = arith.constant 0 : i32
    %11 = arith.cmpi ne, %10, %c0_i32_8 : i32
    scf.if %11 {
      %c0_9 = arith.constant 0 : index
      %c0_10 = arith.constant 0 : index
      %12 = vector.load %arg7[%c0_9, %c0_10] : memref<2x128xf32, #tpu.memory_space<vmem>>, vector<2x128xf32>
      %cst_11 = arith.constant 1.562500e-02 : f32
      %13 = vector.broadcast %cst_11 : f32 to vector<2x128xf32>
      %14 = arith.mulf %12, %13 : vector<2x128xf32>
      %15 = arith.truncf %14 : vector<2x128xf32> to vector<2x128xbf16>
      %c0_12 = arith.constant 0 : index
      %c0_13 = arith.constant 0 : index
      %16 = vector.load %arg2[%c0_12, %c0_13] : memref<128x32xbf16, #tpu.memory_space<vmem>>, vector<128x32xbf16>
      %cst_14 = arith.constant dense<0.000000e+00> : vector<2x32xf32>
      %17 = tpu.matmul %15, %16, %cst_14 {dimension_numbers = #tpu.dot_dimension_numbers<[1], [0], [0], [1], [0, 0, 1, 1], [], []>} : vector<2x128xbf16>, vector<128x32xbf16>, vector<2x32xf32> -> vector<2x32xf32>
      %c0_15 = arith.constant 0 : index
      %c0_16 = arith.constant 0 : index
      %18 = vector.load %arg3[%c0_15, %c0_16] : memref<1x32xf32, #tpu.memory_space<vmem>>, vector<1x32xf32>
      %19 = vector.broadcast %18 : vector<1x32xf32> to vector<2x32xf32>
      %20 = arith.addf %17, %19 : vector<2x32xf32>
      %21 = arith.truncf %20 : vector<2x32xf32> to vector<2x32xbf16>
      %c0_17 = arith.constant 0 : index
      %c0_18 = arith.constant 0 : index
      %22 = vector.load %arg4[%c0_17, %c0_18] : memref<32x128xbf16, #tpu.memory_space<vmem>>, vector<32x128xbf16>
      %cst_19 = arith.constant dense<0.000000e+00> : vector<2x128xf32>
      %23 = tpu.matmul %21, %22, %cst_19 {dimension_numbers = #tpu.dot_dimension_numbers<[1], [0], [0], [1], [0, 0, 1, 1], [], []>} : vector<2x32xbf16>, vector<32x128xbf16>, vector<2x128xf32> -> vector<2x128xf32>
      %c0_20 = arith.constant 0 : index
      %c0_21 = arith.constant 0 : index
      %24 = vector.load %arg5[%c0_20, %c0_21] : memref<1x128xf32, #tpu.memory_space<vmem>>, vector<1x128xf32>
      %25 = vector.broadcast %24 : vector<1x128xf32> to vector<2x128xf32>
      %26 = arith.addf %23, %25 : vector<2x128xf32>
      %27 = arith.negf %26 : vector<2x128xf32>
      %28 = math.exp %27 : vector<2x128xf32>
      %cst_22 = arith.constant 1.000000e+00 : f32
      %29 = vector.broadcast %cst_22 : f32 to vector<2x128xf32>
      %30 = arith.addf %29, %28 : vector<2x128xf32>
      %31 = arith.divf %29, %30 : vector<2x128xf32>
      %c0_23 = arith.constant 0 : index
      %c0_24 = arith.constant 0 : index
      %32 = vector.load %arg6[%c0_23, %c0_24] : memref<2x128xf32, #tpu.memory_space<vmem>>, vector<2x128xf32>
      tpu.vector_store %arg6[%c0_23, %c0_24], %31 {strides = array<i32>} : memref<2x128xf32, #tpu.memory_space<vmem>>, vector<2x128xf32>,
    } else {
    }
    return
  }
  func.func @transform_0(%arg0: i32) -> (i32, i32, i32) {
    %c0_i32 = arith.constant 0 : i32
    %c0_i32_0 = arith.constant 0 : i32
    %c0_i32_1 = arith.constant 0 : i32
    return %c0_i32, %arg0, %c0_i32_0 : i32, i32, i32
  }
  func.func @transform_1(%arg0: i32) -> (i32, i32) {
    %c0_i32 = arith.constant 0 : i32
    %c0_i32_0 = arith.constant 0 : i32
    %c0_i32_1 = arith.constant 0 : i32
    return %c0_i32, %c0_i32_0 : i32, i32
  }
  func.func @transform_2(%arg0: i32) -> (i32, i32) {
    %c0_i32 = arith.constant 0 : i32
    %c0_i32_0 = arith.constant 0 : i32
    %c0_i32_1 = arith.constant 0 : i32
    return %c0_i32, %c0_i32_0 : i32, i32
  }
  func.func @transform_3(%arg0: i32) -> (i32, i32) {
    %c0_i32 = arith.constant 0 : i32
    %c0_i32_0 = arith.constant 0 : i32
    %c0_i32_1 = arith.constant 0 : i32
    return %c0_i32, %c0_i32_0 : i32, i32
  }
  func.func @transform_4(%arg0: i32) -> (i32, i32) {
    %c0_i32 = arith.constant 0 : i32
    %c0_i32_0 = arith.constant 0 : i32
    %c0_i32_1 = arith.constant 0 : i32
    return %c0_i32, %c0_i32_0 : i32, i32
  }
  func.func @transform_5(%arg0: i32) -> (i32, i32) {
    %c0_i32 = arith.constant 0 : i32
    %c0_i32_0 = arith.constant 0 : i32
    %c0_i32_1 = arith.constant 0 : i32
    return %c0_i32, %c0_i32_0 : i32, i32
  }
}

module attributes {stable_mosaic.version = 11 : i64} {
  func.func @_se_res_kernel(%arg0: i32, %arg1: memref<2x64x128xbf16, #tpu.memory_space<vmem>>, %arg2: memref<2x64x128xbf16, #tpu.memory_space<vmem>>, %arg3: memref<2x1x128xf32, #tpu.memory_space<vmem>>, %arg4: memref<2x64x128xbf16, #tpu.memory_space<vmem>>) attributes {dimension_semantics = [#tpu.dimension_semantics<parallel>], iteration_bounds = array<i64: 1>, scalar_prefetch = 0 : i64, scratch_operands = 0 : i64, tpu.core_type = #tpu.core_type<tc>, window_params = [{transform_indices = @transform_0, window_bounds = array<i64: 2, 64, 128>}, {transform_indices = @transform_1, window_bounds = array<i64: 2, 64, 128>}, {pipeline_mode = #tpu.pipeline_mode<synchronous>, transform_indices = @transform_2, window_bounds = array<i64: 2, 1, 128>}, {transform_indices = @transform_3, window_bounds = array<i64: 2, 64, 128>}]} {
    %c0 = arith.constant 0 : index
    %c0_0 = arith.constant 0 : index
    %c0_1 = arith.constant 0 : index
    %0 = vector.load %arg1[%c0, %c0_0, %c0_1] : memref<2x64x128xbf16, #tpu.memory_space<vmem>>, vector<2x64x128xbf16>
    %1 = arith.extf %0 : vector<2x64x128xbf16> to vector<2x64x128xf32>
    %c0_2 = arith.constant 0 : index
    %c0_3 = arith.constant 0 : index
    %c0_4 = arith.constant 0 : index
    %2 = vector.load %arg3[%c0_2, %c0_3, %c0_4] : memref<2x1x128xf32, #tpu.memory_space<vmem>>, vector<2x1x128xf32>
    %c0_5 = arith.constant 0 : index
    %c0_6 = arith.constant 0 : index
    %c0_7 = arith.constant 0 : index
    %3 = vector.load %arg2[%c0_5, %c0_6, %c0_7] : memref<2x64x128xbf16, #tpu.memory_space<vmem>>, vector<2x64x128xbf16>
    %4 = arith.extf %3 : vector<2x64x128xbf16> to vector<2x64x128xf32>
    %5 = vector.broadcast %2 : vector<2x1x128xf32> to vector<2x64x128xf32>
    %6 = arith.mulf %5, %4 : vector<2x64x128xf32>
    %7 = arith.addf %1, %6 : vector<2x64x128xf32>
    %cst = arith.constant 0.000000e+00 : f32
    %8 = vector.broadcast %cst : f32 to vector<2x64x128xf32>
    %9 = arith.maximumf %7, %8 : vector<2x64x128xf32>
    %10 = arith.truncf %9 : vector<2x64x128xf32> to vector<2x64x128xbf16>
    %c0_8 = arith.constant 0 : index
    %c0_9 = arith.constant 0 : index
    %c0_10 = arith.constant 0 : index
    %11 = vector.load %arg4[%c0_8, %c0_9, %c0_10] : memref<2x64x128xbf16, #tpu.memory_space<vmem>>, vector<2x64x128xbf16>
    tpu.vector_store %arg4[%c0_8, %c0_9, %c0_10], %10 {strides = array<i32>} : memref<2x64x128xbf16, #tpu.memory_space<vmem>>, vector<2x64x128xbf16>,
    return
  }
  func.func @transform_0(%arg0: i32) -> (i32, i32, i32) {
    %c0_i32 = arith.constant 0 : i32
    %c0_i32_0 = arith.constant 0 : i32
    %c0_i32_1 = arith.constant 0 : i32
    return %c0_i32, %arg0, %c0_i32_0 : i32, i32, i32
  }
  func.func @transform_1(%arg0: i32) -> (i32, i32, i32) {
    %c0_i32 = arith.constant 0 : i32
    %c0_i32_0 = arith.constant 0 : i32
    %c0_i32_1 = arith.constant 0 : i32
    return %c0_i32, %arg0, %c0_i32_0 : i32, i32, i32
  }
  func.func @transform_2(%arg0: i32) -> (i32, i32, i32) {
    %c0_i32 = arith.constant 0 : i32
    %c0_i32_0 = arith.constant 0 : i32
    %c0_i32_1 = arith.constant 0 : i32
    %c0_i32_2 = arith.constant 0 : i32
    return %c0_i32, %c0_i32_0, %c0_i32_1 : i32, i32, i32
  }
  func.func @transform_3(%arg0: i32) -> (i32, i32, i32) {
    %c0_i32 = arith.constant 0 : i32
    %c0_i32_0 = arith.constant 0 : i32
    %c0_i32_1 = arith.constant 0 : i32
    return %c0_i32, %arg0, %c0_i32_0 : i32, i32, i32
  }
}

</mosaic_0001>

<bundles_post_ra>
// kernel: bottleneck_forward.6
= control target key start
LH: loop header
LB: loop body
LE: loop exit
PB: predicated region body
PF: predicated region fallthrough
CT: control target
= control target key end

     0   :  { %vm107_vm0 = vcmask 523264   ;;  %s436_s1 = inlined_call_operand.vmem [shape: bf16[64,128], index: 1, kind: input, shape index: {}]   ;;  %s437_s2 = inlined_call_operand.vmem [shape: f32[1,128], index: 2, kind: input, shape index: {}]   ;;  %s438_s0 = inlined_call_operand.vmem [shape: bf16[128,64], index: 0, kind: input, shape index: {}]   ;;  %s439_s3 = inlined_call_operand.vmem [shape: bf16[128,128], index: 3, kind: output, shape index: {}]  }
   0x1   :  { %v284_v0 = vld [vmem:[%s436_s1 + $0x18] sm:$0xff]  ;;  %v283_v1 = vld [vmem:[%s436_s1 + $0x10] sm:$0xff]  ;;  %v282_v2 = vld [vmem:[%s436_s1 + $0x8] sm:$0xff] }
   0x2   :  { %136 = vmatpush.bf16.msra.mxu0 %v284_v0  ;;  %332 = vmatpush.bf16.msra.mxu1 %v284_v0  ;;  %v281_v3 = vld [vmem:[%s436_s1] sm:$0xff]  ;;  %v275_v5 = vld [vmem:[%s438_s0 + $0x10] sm:$0xff]  ;;  %v274_v8 = vld [vmem:[%s438_s0 + $0x8] sm:$0xff] }
   0x3   :  { %333 = vmatpush.bf16.msra.mxu2 %v284_v0  ;;  %334 = vmatpush.bf16.msra.mxu3 %v284_v0  ;;  %v273_v4 = vld [vmem:[%s438_s0] sm:$0xff]  ;;  %v279_v7 = vld [vmem:[%s438_s0 + $0x30] sm:$0xff]  ;;  %v276_v9 = vld [vmem:[%s438_s0 + $0x18] sm:$0xff] }
   0x4   :  { %v277_v6 = vld [vmem:[%s438_s0 + $0x20] sm:$0xff]  ;;  %v278_v10 = vld [vmem:[%s438_s0 + $0x28] sm:$0xff]  ;;  %v280_v11 = vld [vmem:[%s438_s0 + $0x38] sm:$0xff] }
   0x5   :  { %v344_v14 = vld [vmem:[%s437_s2] ss:$0 sm:$0xff] }
   0x6   :  { %137 = vmatpush.bf16.msra.mxu0 %v283_v1  ;;  %335 = vmatpush.bf16.msra.mxu1 %v283_v1 }
   0x7   :  { %336 = vmatpush.bf16.msra.mxu2 %v283_v1  ;;  %337 = vmatpush.bf16.msra.mxu3 %v283_v1 }
   0xa   :  { %138 = vmatpush.bf16.msra.mxu0 %v282_v2  ;;  %338 = vmatpush.bf16.msra.mxu1 %v282_v2 }
   0xb   :  { %339 = vmatpush.bf16.msra.mxu2 %v282_v2  ;;  %340 = vmatpush.bf16.msra.mxu3 %v282_v2 }
   0xe   :  { %139 = vmatpush.bf16.msra.mxu0 %v281_v3  ;;  %341 = vmatpush.bf16.msra.mxu1 %v281_v3 }
   0xf   :  { %342 = vmatpush.bf16.msra.mxu2 %v281_v3  ;;  %343 = vmatpush.bf16.msra.mxu3 %v281_v3 }
  0x11   :  { %265 = vmatmul.msk.bf16.vlgmr.msra.gmra.mxu0 %vm107_vm0, %v273_v4  ;;  %267 = vmatmul.msk.bf16.vlgmr.msra.gmra.mxu1 %vm107_vm0, %v275_v5 }
  0x12   :  { %269 = vmatmul.msk.bf16.vlgmr.msra.gmra.mxu2 %vm107_vm0, %v277_v6  ;;  %271 = vmatmul.msk.bf16.vlgmr.msra.gmra.mxu3 %vm107_vm0, %v279_v7 }
  0x21   :  { %266 = vmatmul.msk.bf16.gmra.mxu0 %vm107_vm0, %v274_v8  ;;  %268 = vmatmul.msk.bf16.gmra.mxu1 %vm107_vm0, %v276_v9 }
  0x22   :  { %270 = vmatmul.msk.bf16.gmra.mxu2 %vm107_vm0, %v278_v10  ;;  %272 = vmatmul.msk.bf16.gmra.mxu3 %vm107_vm0, %v280_v11 }
  0x8e   :  { %v141_v12 = vpop.f32.mrf.mxu0  ;;  %v151_v13 = vpop.f32.mrf.mxu1 }
  0x8f   :  { %v142_v19 = vadd.f32 %v344_v14, %v141_v12  ;;  %v152_v20 = vadd.f32 %v344_v14, %v151_v13 }
  0x95   :  { %v161_v15 = vpop.f32.mrf.mxu2  ;;  %v171_v16 = vpop.f32.mrf.mxu3 }
  0x96   :  { %v143_v17 = vpop.f32.mrf.mxu0  ;;  %v153_v18 = vpop.f32.mrf.mxu1  ;;  %v162_v27 = vadd.f32 %v344_v14, %v161_v15  ;;  %v172_v28 = vadd.f32 %v344_v14, %v171_v16 }
  0x97   :  { %v144_v21 = vadd.f32 %v344_v14, %v143_v17  ;;  %v154_v22 = vadd.f32 %v344_v14, %v153_v18 }
  0x99   :  { %v288_v23 = vpack.c.bf16 %v144_v21, %v142_v19  ;;  %v298_v24 = vpack.c.bf16 %v154_v22, %v152_v20 }
  0x9b   :  { %289 = vst [vmem:[%s439_s3] sm:$0xff] %v288_v23  }
  0x9c   :  { %326 = vst [vmem:[%s439_s3 + $0x10] sm:$0xff] %v298_v24  }
  0x9d   :  { %v163_v25 = vpop.f32.mrf.mxu2  ;;  %v173_v26 = vpop.f32.mrf.mxu3 }
  0x9e   :  { %v164_v29 = vadd.f32 %v344_v14, %v163_v25  ;;  %v174_v30 = vadd.f32 %v344_v14, %v173_v26  ;;  %v146_v31 = vpop.f32.mrf.mxu0  ;;  %v156_v32 = vpop.f32.mrf.mxu1 }
  0x9f   :  { %v147_v39 = vadd.f32 %v344_v14, %v146_v31  ;;  %v157_v40 = vadd.f32 %v344_v14, %v156_v32 }
  0xa0   :  { %v308_v33 = vpack.c.bf16 %v164_v29, %v162_v27  ;;  %v318_v34 = vpack.c.bf16 %v174_v30, %v172_v28 }
  0xa2   :  { %328 = vst [vmem:[%s439_s3 + $0x20] sm:$0xff] %v308_v33  }
  0xa3   :  { %330 = vst [vmem:[%s439_s3 + $0x30] sm:$0xff] %v318_v34  }
  0xa5   :  { %v166_v35 = vpop.f32.mrf.mxu2  ;;  %v176_v36 = vpop.f32.mrf.mxu3 }
  0xa6   :  { %v148_v37 = vpop.f32.mrf.mxu0  ;;  %v158_v38 = vpop.f32.mrf.mxu1  ;;  %v167_v47 = vadd.f32 %v344_v14, %v166_v35  ;;  %v177_v48 = vadd.f32 %v344_v14, %v176_v36 }
  0xa7   :  { %v149_v41 = vadd.f32 %v344_v14, %v148_v37  ;;  %v159_v42 = vadd.f32 %v344_v14, %v158_v38 }
  0xa9   :  { %v293_v43 = vpack.c.bf16 %v149_v41, %v147_v39  ;;  %v303_v44 = vpack.c.bf16 %v159_v42, %v157_v40 }
  0xab   :  { %325 = vst [vmem:[%s439_s3 + $0x8] sm:$0xff] %v293_v43  }
  0xac   :  { %327 = vst [vmem:[%s439_s3 + $0x18] sm:$0xff] %v303_v44  }
  0xad   :  { %v168_v45 = vpop.f32.mrf.mxu2  ;;  %v178_v46 = vpop.f32.mrf.mxu3 }
  0xae   :  { %v169_v49 = vadd.f32 %v344_v14, %v168_v45  ;;  %v179_v50 = vadd.f32 %v344_v14, %v178_v46 }
  0xb0   :  { %v313_v51 = vpack.c.bf16 %v169_v49, %v167_v47  ;;  %v323_v52 = vpack.c.bf16 %v179_v50, %v177_v48 }
  0xb2   :  { %329 = vst [vmem:[%s439_s3 + $0x28] sm:$0xff] %v313_v51  }
  0xb3   :  { %331 = vst [vmem:[%s439_s3 + $0x38] sm:$0xff] %v323_v52  }

// kernel: bottleneck_forward.7
= control target key start
LH: loop header
LB: loop body
LE: loop exit
PB: predicated region body
PF: predicated region fallthrough
CT: control target
= control target key end

     0   :  { %vm275_vm0 = vcmask 523264   ;;  %s1478_s1 = inlined_call_operand.vmem [shape: bf16[64,128], index: 1, kind: input, shape index: {}]   ;;  %s1479_s2 = inlined_call_operand.vmem [shape: f32[1,128], index: 2, kind: input, shape index: {}]   ;;  %s1480_s0 = inlined_call_operand.vmem [shape: bf16[512,64], index: 0, kind: input, shape index: {}]   ;;  %s1481_s3 = inlined_call_operand.vmem [shape: bf16[512,128], index: 3, kind: output, shape index: {}]  }
   0x1   :  { %v948_v0 = vld [vmem:[%s1478_s1 + $0x18] sm:$0xff]  ;;  %v947_v1 = vld [vmem:[%s1478_s1 + $0x10] sm:$0xff]  ;;  %v946_v2 = vld [vmem:[%s1478_s1 + $0x8] sm:$0xff] }
   0x2   :  { %376 = vmatpush.bf16.msra.mxu0 %v948_v0  ;;  %1140 = vmatpush.bf16.msra.mxu1 %v948_v0  ;;  %v945_v3 = vld [vmem:[%s1478_s1] sm:$0xff]  ;;  %v914_v8 = vld [vmem:[%s1480_s0 + $0x8] sm:$0xff]  ;;  %v915_v12 = vld [vmem:[%s1480_s0 + $0x10] sm:$0xff] }
   0x3   :  { %1141 = vmatpush.bf16.msra.mxu2 %v948_v0  ;;  %1142 = vmatpush.bf16.msra.mxu3 %v948_v0  ;;  %v913_v4 = vld [vmem:[%s1480_s0] sm:$0xff]  ;;  %v922_v9 = vld [vmem:[%s1480_s0 + $0x48] sm:$0xff]  ;;  %v923_v13 = vld [vmem:[%s1480_s0 + $0x50] sm:$0xff] }
   0x4   :  { %v921_v5 = vld [vmem:[%s1480_s0 + $0x40] sm:$0xff]  ;;  %v930_v10 = vld [vmem:[%s1480_s0 + $0x88] sm:$0xff]  ;;  %v931_v14 = vld [vmem:[%s1480_s0 + $0x90] sm:$0xff] }
   0x5   :  { %v929_v6 = vld [vmem:[%s1480_s0 + $0x80] sm:$0xff]  ;;  %v938_v11 = vld [vmem:[%s1480_s0 + $0xc8] sm:$0xff]  ;;  %v939_v15 = vld [vmem:[%s1480_s0 + $0xd0] sm:$0xff] }
   0x6   :  { %377 = vmatpush.bf16.msra.mxu0 %v947_v1  ;;  %1143 = vmatpush.bf16.msra.mxu1 %v947_v1  ;;  %v937_v7 = vld [vmem:[%s1480_s0 + $0xc0] sm:$0xff]  ;;  %v916_v16 = vld [vmem:[%s1480_s0 + $0x18] sm:$0xff]  ;;  %v918_v24 = vld [vmem:[%s1480_s0 + $0x28] sm:$0xff] }
   0x7   :  { %1144 = vmatpush.bf16.msra.mxu2 %v947_v1  ;;  %1145 = vmatpush.bf16.msra.mxu3 %v947_v1  ;;  %v924_v17 = vld [vmem:[%s1480_s0 + $0x58] sm:$0xff]  ;;  %v917_v20 = vld [vmem:[%s1480_s0 + $0x20] sm:$0xff]  ;;  %v926_v25 = vld [vmem:[%s1480_s0 + $0x68] sm:$0xff] }
   0x8   :  { %v932_v18 = vld [vmem:[%s1480_s0 + $0x98] sm:$0xff]  ;;  %v925_v21 = vld [vmem:[%s1480_s0 + $0x60] sm:$0xff]  ;;  %v934_v26 = vld [vmem:[%s1480_s0 + $0xa8] sm:$0xff] }
   0x9   :  { %v940_v19 = vld [vmem:[%s1480_s0 + $0xd8] sm:$0xff]  ;;  %v933_v22 = vld [vmem:[%s1480_s0 + $0xa0] sm:$0xff]  ;;  %v942_v27 = vld [vmem:[%s1480_s0 + $0xe8] sm:$0xff] }
   0xa   :  { %378 = vmatpush.bf16.msra.mxu0 %v946_v2  ;;  %1146 = vmatpush.bf16.msra.mxu1 %v946_v2  ;;  %v941_v23 = vld [vmem:[%s1480_s0 + $0xe0] sm:$0xff]  ;;  %v919_v28 = vld [vmem:[%s1480_s0 + $0x30] sm:$0xff]  ;;  %v920_v32 = vld [vmem:[%s1480_s0 + $0x38] sm:$0xff] }
   0xb   :  { %1147 = vmatpush.bf16.msra.mxu2 %v946_v2  ;;  %1148 = vmatpush.bf16.msra.mxu3 %v946_v2  ;;  %v927_v29 = vld [vmem:[%s1480_s0 + $0x70] sm:$0xff]  ;;  %v928_v33 = vld [vmem:[%s1480_s0 + $0x78] sm:$0xff]  ;;  %v1316_v38 = vld [vmem:[%s1479_s2] ss:$0 sm:$0xff] }
   0xc   :  { %v935_v30 = vld [vmem:[%s1480_s0 + $0xb0] sm:$0xff]  ;;  %v936_v34 = vld [vmem:[%s1480_s0 + $0xb8] sm:$0xff] }
   0xd   :  { %v943_v31 = vld [vmem:[%s1480_s0 + $0xf0] sm:$0xff]  ;;  %v944_v35 = vld [vmem:[%s1480_s0 + $0xf8] sm:$0xff] }
   0xe   :  { %379 = vmatpush.bf16.msra.mxu0 %v945_v3  ;;  %1149 = vmatpush.bf16.msra.mxu1 %v945_v3 }
   0xf   :  { %1150 = vmatpush.bf16.msra.mxu2 %v945_v3  ;;  %1151 = vmatpush.bf16.msra.mxu3 %v945_v3 }
  0x11   :  { %881 = vmatmul.msk.bf16.vlgmr.msra.gmra.mxu0 %vm275_vm0, %v913_v4  ;;  %889 = vmatmul.msk.bf16.vlgmr.msra.gmra.mxu1 %vm275_vm0, %v921_v5 }
  0x12   :  { %897 = vmatmul.msk.bf16.vlgmr.msra.gmra.mxu2 %vm275_vm0, %v929_v6  ;;  %905 = vmatmul.msk.bf16.vlgmr.msra.gmra.mxu3 %vm275_vm0, %v937_v7 }
  0x21   :  { %882 = vmatmul.msk.bf16.gmra.mxu0 %vm275_vm0, %v914_v8  ;;  %890 = vmatmul.msk.bf16.gmra.mxu1 %vm275_vm0, %v922_v9 }
  0x22   :  { %898 = vmatmul.msk.bf16.gmra.mxu2 %vm275_vm0, %v930_v10  ;;  %906 = vmatmul.msk.bf16.gmra.mxu3 %vm275_vm0, %v938_v11 }
  0x31   :  { %883 = vmatmul.msk.bf16.gmra.mxu0 %vm275_vm0, %v915_v12  ;;  %891 = vmatmul.msk.bf16.gmra.mxu1 %vm275_vm0, %v923_v13 }
  0x32   :  { %899 = vmatmul.msk.bf16.gmra.mxu2 %vm275_vm0, %v931_v14  ;;  %907 = vmatmul.msk.bf16.gmra.mxu3 %vm275_vm0, %v939_v15 }
  0x41   :  { %884 = vmatmul.msk.bf16.gmra.mxu0 %vm275_vm0, %v916_v16  ;;  %892 = vmatmul.msk.bf16.gmra.mxu1 %vm275_vm0, %v924_v17 }
  0x42   :  { %900 = vmatmul.msk.bf16.gmra.mxu2 %vm275_vm0, %v932_v18  ;;  %908 = vmatmul.msk.bf16.gmra.mxu3 %vm275_vm0, %v940_v19 }
  0x51   :  { %885 = vmatmul.msk.bf16.gmra.mxu0 %vm275_vm0, %v917_v20  ;;  %893 = vmatmul.msk.bf16.gmra.mxu1 %vm275_vm0, %v925_v21 }
  0x52   :  { %901 = vmatmul.msk.bf16.gmra.mxu2 %vm275_vm0, %v933_v22  ;;  %909 = vmatmul.msk.bf16.gmra.mxu3 %vm275_vm0, %v941_v23 }
  0x61   :  { %886 = vmatmul.msk.bf16.gmra.mxu0 %vm275_vm0, %v918_v24  ;;  %894 = vmatmul.msk.bf16.gmra.mxu1 %vm275_vm0, %v926_v25 }
  0x62   :  { %902 = vmatmul.msk.bf16.gmra.mxu2 %vm275_vm0, %v934_v26  ;;  %910 = vmatmul.msk.bf16.gmra.mxu3 %vm275_vm0, %v942_v27 }
  0x71   :  { %887 = vmatmul.msk.bf16.gmra.mxu0 %vm275_vm0, %v919_v28  ;;  %895 = vmatmul.msk.bf16.gmra.mxu1 %vm275_vm0, %v927_v29 }
  0x72   :  { %903 = vmatmul.msk.bf16.gmra.mxu2 %vm275_vm0, %v935_v30  ;;  %911 = vmatmul.msk.bf16.gmra.mxu3 %vm275_vm0, %v943_v31 }
  0x81   :  { %888 = vmatmul.msk.bf16.gmra.mxu0 %vm275_vm0, %v920_v32  ;;  %896 = vmatmul.msk.bf16.gmra.mxu1 %vm275_vm0, %v928_v33 }
  0x82   :  { %904 = vmatmul.msk.bf16.gmra.mxu2 %vm275_vm0, %v936_v34  ;;  %912 = vmatmul.msk.bf16.gmra.mxu3 %vm275_vm0, %v944_v35 }
  0x8e   :  { %v381_v36 = vpop.f32.mrf.mxu0  ;;  %v421_v37 = vpop.f32.mrf.mxu1 }
  0x8f   :  { %v382_v39 = vadd.f32 %v1316_v38, %v381_v36  ;;  %v422_v40 = vadd.f32 %v1316_v38, %v421_v37 }
  0x91   :  { %v541_v47 = vmax.f32 %v382_v39, 0.0  ;;  %v557_v48 = vmax.f32 %v422_v40, 0.0 }
  0x95   :  { %v461_v41 = vpop.f32.mrf.mxu2  ;;  %v501_v42 = vpop.f32.mrf.mxu3 }
  0x96   :  { %v383_v43 = vpop.f32.mrf.mxu0  ;;  %v423_v44 = vpop.f32.mrf.mxu1  ;;  %v462_v53 = vadd.f32 %v1316_v38, %v461_v41  ;;  %v502_v54 = vadd.f32 %v1316_v38, %v501_v42 }
  0x97   :  { %v384_v45 = vadd.f32 %v1316_v38, %v383_v43  ;;  %v424_v46 = vadd.f32 %v1316_v38, %v423_v44 }
  0x98   :  { %v573_v61 = vmax.f32 %v462_v53, 0.0  ;;  %v589_v62 = vmax.f32 %v502_v54, 0.0 }
  0x99   :  { %v542_v49 = vmax.f32 %v384_v45, 0.0  ;;  %v558_v50 = vmax.f32 %v424_v46, 0.0 }
  0x9b   :  { %v952_v51 = vpack.c.bf16 %v542_v49, %v541_v47  ;;  %v992_v52 = vpack.c.bf16 %v558_v50, %v557_v48 }
  0x9d   :  { %953 = vst [vmem:[%s1481_s3] sm:$0xff] %v952_v51   ;;  %v463_v55 = vpop.f32.mrf.mxu2  ;;  %v503_v56 = vpop.f32.mrf.mxu3 }
  0x9e   :  { %1116 = vst [vmem:[%s1481_s3 + $0x40] sm:$0xff] %v992_v52   ;;  %v464_v57 = vadd.f32 %v1316_v38, %v463_v55  ;;  %v504_v58 = vadd.f32 %v1316_v38, %v503_v56  ;;  %v386_v59 = vpop.f32.mrf.mxu0  ;;  %v426_v60 = vpop.f32.mrf.mxu1 }
  0x9f   :  { %v387_v3 = vadd.f32 %v1316_v38, %v386_v59  ;;  %v427_v4 = vadd.f32 %v1316_v38, %v426_v60 }
  0xa0   :  { %v574_v63 = vmax.f32 %v464_v57, 0.0  ;;  %v590_v0 = vmax.f32 %v504_v58, 0.0 }
  0xa1   :  { %v543_v11 = vmax.f32 %v387_v3, 0.0  ;;  %v559_v12 = vmax.f32 %v427_v4, 0.0 }
  0xa2   :  { %v1032_v1 = vpack.c.bf16 %v574_v63, %v573_v61  ;;  %v1072_v2 = vpack.c.bf16 %v590_v0, %v589_v62 }
  0xa4   :  { %1124 = vst [vmem:[%s1481_s3 + $0x80] sm:$0xff] %v1032_v1  }
  0xa5   :  { %1132 = vst [vmem:[%s1481_s3 + $0xc0] sm:$0xff] %v1072_v2   ;;  %v466_v5 = vpop.f32.mrf.mxu2  ;;  %v506_v6 = vpop.f32.mrf.mxu3 }
  0xa6   :  { %v388_v7 = vpop.f32.mrf.mxu0  ;;  %v428_v8 = vpop.f32.mrf.mxu1  ;;  %v467_v17 = vadd.f32 %v1316_v38, %v466_v5  ;;  %v507_v18 = vadd.f32 %v1316_v38, %v506_v6 }
  0xa7   :  { %v389_v9 = vadd.f32 %v1316_v38, %v388_v7  ;;  %v429_v10 = vadd.f32 %v1316_v38, %v428_v8 }
  0xa8   :  { %v575_v25 = vmax.f32 %v467_v17, 0.0  ;;  %v591_v26 = vmax.f32 %v507_v18, 0.0 }
  0xa9   :  { %v544_v13 = vmax.f32 %v389_v9, 0.0  ;;  %v560_v14 = vmax.f32 %v429_v10, 0.0 }
  0xab   :  { %v957_v15 = vpack.c.bf16 %v544_v13, %v543_v11  ;;  %v997_v16 = vpack.c.bf16 %v560_v14, %v559_v12 }
  0xad   :  { %1109 = vst [vmem:[%s1481_s3 + $0x8] sm:$0xff] %v957_v15   ;;  %v468_v19 = vpop.f32.mrf.mxu2  ;;  %v508_v20 = vpop.f32.mrf.mxu3 }
  0xae   :  { %1117 = vst [vmem:[%s1481_s3 + $0x48] sm:$0xff] %v997_v16   ;;  %v469_v21 = vadd.f32 %v1316_v38, %v468_v19  ;;  %v509_v22 = vadd.f32 %v1316_v38, %v508_v20  ;;  %v391_v23 = vpop.f32.mrf.mxu0  ;;  %v431_v24 = vpop.f32.mrf.mxu1 }
  0xaf   :  { %v392_v31 = vadd.f32 %v1316_v38, %v391_v23  ;;  %v432_v32 = vadd.f32 %v1316_v38, %v431_v24 }
  0xb0   :  { %v576_v27 = vmax.f32 %v469_v21, 0.0  ;;  %v592_v28 = vmax.f32 %v509_v22, 0.0 }
  0xb1   :  { %v545_v40 = vmax.f32 %v392_v31, 0.0  ;;  %v561_v41 = vmax.f32 %v432_v32, 0.0 }
  0xb2   :  { %v1037_v29 = vpack.c.bf16 %v576_v27, %v575_v25  ;;  %v1077_v30 = vpack.c.bf16 %v592_v28, %v591_v26 }
  0xb4   :  { %1125 = vst [vmem:[%s1481_s3 + $0x88] sm:$0xff] %v1037_v29  }
  0xb5   :  { %1133 = vst [vmem:[%s1481_s3 + $0xc8] sm:$0xff] %v1077_v30   ;;  %v471_v33 = vpop.f32.mrf.mxu2  ;;  %v511_v34 = vpop.f32.mrf.mxu3 }
  0xb6   :  { %v393_v35 = vpop.f32.mrf.mxu0  ;;  %v433_v36 = vpop.f32.mrf.mxu1  ;;  %v472_v46 = vadd.f32 %v1316_v38, %v471_v33  ;;  %v512_v47 = vadd.f32 %v1316_v38, %v511_v34 }
  0xb7   :  { %v394_v37 = vadd.f32 %v1316_v38, %v393_v35  ;;  %v434_v39 = vadd.f32 %v1316_v38, %v433_v36 }
  0xb8   :  { %v577_v54 = vmax.f32 %v472_v46, 0.0  ;;  %v593_v55 = vmax.f32 %v512_v47, 0.0 }
  0xb9   :  { %v546_v42 = vmax.f32 %v394_v37, 0.0  ;;  %v562_v43 = vmax.f32 %v434_v39, 0.0 }
  0xbb   :  { %v962_v44 = vpack.c.bf16 %v546_v42, %v545_v40  ;;  %v1002_v45 = vpack.c.bf16 %v562_v43, %v561_v41 }
  0xbd   :  { %1110 = vst [vmem:[%s1481_s3 + $0x10] sm:$0xff] %v962_v44   ;;  %v473_v48 = vpop.f32.mrf.mxu2  ;;  %v513_v49 = vpop.f32.mrf.mxu3 }
  0xbe   :  { %1118 = vst [vmem:[%s1481_s3 + $0x50] sm:$0xff] %v1002_v45   ;;  %v474_v50 = vadd.f32 %v1316_v38, %v473_v48  ;;  %v514_v51 = vadd.f32 %v1316_v38, %v513_v49  ;;  %v396_v52 = vpop.f32.mrf.mxu0  ;;  %v436_v53 = vpop.f32.mrf.mxu1 }
  0xbf   :  { %v397_v60 = vadd.f32 %v1316_v38, %v396_v52  ;;  %v437_v61 = vadd.f32 %v1316_v38, %v436_v53 }
  0xc0   :  { %v578_v56 = vmax.f32 %v474_v50, 0.0  ;;  %v594_v57 = vmax.f32 %v514_v51, 0.0 }
  0xc1   :  { %v547_v4 = vmax.f32 %v397_v60, 0.0  ;;  %v563_v5 = vmax.f32 %v437_v61, 0.0 }
  0xc2   :  { %v1042_v58 = vpack.c.bf16 %v578_v56, %v577_v54  ;;  %v1082_v59 = vpack.c.bf16 %v594_v57, %v593_v55 }
  0xc4   :  { %1126 = vst [vmem:[%s1481_s3 + $0x90] sm:$0xff] %v1042_v58  }
  0xc5   :  { %1134 = vst [vmem:[%s1481_s3 + $0xd0] sm:$0xff] %v1082_v59   ;;  %v476_v62 = vpop.f32.mrf.mxu2  ;;  %v516_v63 = vpop.f32.mrf.mxu3 }
  0xc6   :  { %v398_v0 = vpop.f32.mrf.mxu0  ;;  %v438_v1 = vpop.f32.mrf.mxu1  ;;  %v477_v10 = vadd.f32 %v1316_v38, %v476_v62  ;;  %v517_v11 = vadd.f32 %v1316_v38, %v516_v63 }
  0xc7   :  { %v399_v2 = vadd.f32 %v1316_v38, %v398_v0  ;;  %v439_v3 = vadd.f32 %v1316_v38, %v438_v1 }
  0xc8   :  { %v579_v18 = vmax.f32 %v477_v10, 0.0  ;;  %v595_v19 = vmax.f32 %v517_v11, 0.0 }
  0xc9   :  { %v548_v6 = vmax.f32 %v399_v2, 0.0  ;;  %v564_v7 = vmax.f32 %v439_v3, 0.0 }
  0xcb   :  { %v967_v8 = vpack.c.bf16 %v548_v6, %v547_v4  ;;  %v1007_v9 = vpack.c.bf16 %v564_v7, %v563_v5 }
  0xcd   :  { %1111 = vst [vmem:[%s1481_s3 + $0x18] sm:$0xff] %v967_v8   ;;  %v478_v12 = vpop.f32.mrf.mxu2  ;;  %v518_v13 = vpop.f32.mrf.mxu3 }
  0xce   :  { %1119 = vst [vmem:[%s1481_s3 + $0x58] sm:$0xff] %v1007_v9   ;;  %v479_v14 = vadd.f32 %v1316_v38, %v478_v12  ;;  %v519_v15 = vadd.f32 %v1316_v38, %v518_v13  ;;  %v401_v16 = vpop.f32.mrf.mxu0  ;;  %v441_v17 = vpop.f32.mrf.mxu1 }
  0xcf   :  { %v402_v24 = vadd.f32 %v1316_v38, %v401_v16  ;;  %v442_v25 = vadd.f32 %v1316_v38, %v441_v17 }
  0xd0   :  { %v580_v20 = vmax.f32 %v479_v14, 0.0  ;;  %v596_v21 = vmax.f32 %v519_v15, 0.0 }
  0xd1   :  { %v549_v32 = vmax.f32 %v402_v24, 0.0  ;;  %v565_v33 = vmax.f32 %v442_v25, 0.0 }
  0xd2   :  { %v1047_v22 = vpack.c.bf16 %v580_v20, %v579_v18  ;;  %v1087_v23 = vpack.c.bf16 %v596_v21, %v595_v19 }
  0xd4   :  { %1127 = vst [vmem:[%s1481_s3 + $0x98] sm:$0xff] %v1047_v22  }
  0xd5   :  { %1135 = vst [vmem:[%s1481_s3 + $0xd8] sm:$0xff] %v1087_v23   ;;  %v481_v26 = vpop.f32.mrf.mxu2  ;;  %v521_v27 = vpop.f32.mrf.mxu3 }
  0xd6   :  { %v403_v28 = vpop.f32.mrf.mxu0  ;;  %v443_v29 = vpop.f32.mrf.mxu1  ;;  %v482_v39 = vadd.f32 %v1316_v38, %v481_v26  ;;  %v522_v40 = vadd.f32 %v1316_v38, %v521_v27 }
  0xd7   :  { %v404_v30 = vadd.f32 %v1316_v38, %v403_v28  ;;  %v444_v31 = vadd.f32 %v1316_v38, %v443_v29 }
  0xd8   :  { %v581_v47 = vmax.f32 %v482_v39, 0.0  ;;  %v597_v48 = vmax.f32 %v522_v40, 0.0 }
  0xd9   :  { %v550_v34 = vmax.f32 %v404_v30, 0.0  ;;  %v566_v35 = vmax.f32 %v444_v31, 0.0 }
  0xdb   :  { %v972_v36 = vpack.c.bf16 %v550_v34, %v549_v32  ;;  %v1012_v37 = vpack.c.bf16 %v566_v35, %v565_v33 }
  0xdd   :  { %1112 = vst [vmem:[%s1481_s3 + $0x20] sm:$0xff] %v972_v36   ;;  %v483_v41 = vpop.f32.mrf.mxu2  ;;  %v523_v42 = vpop.f32.mrf.mxu3 }
  0xde   :  { %1120 = vst [vmem:[%s1481_s3 + $0x60] sm:$0xff] %v1012_v37   ;;  %v484_v43 = vadd.f32 %v1316_v38, %v483_v41  ;;  %v524_v44 = vadd.f32 %v1316_v38, %v523_v42  ;;  %v406_v45 = vpop.f32.mrf.mxu0  ;;  %v446_v46 = vpop.f32.mrf.mxu1 }
  0xdf   :  { %v407_v53 = vadd.f32 %v1316_v38, %v406_v45  ;;  %v447_v54 = vadd.f32 %v1316_v38, %v446_v46 }
  0xe0   :  { %v582_v49 = vmax.f32 %v484_v43, 0.0  ;;  %v598_v50 = vmax.f32 %v524_v44, 0.0 }
  0xe1   :  { %v551_v61 = vmax.f32 %v407_v53, 0.0  ;;  %v567_v62 = vmax.f32 %v447_v54, 0.0 }
  0xe2   :  { %v1052_v51 = vpack.c.bf16 %v582_v49, %v581_v47  ;;  %v1092_v52 = vpack.c.bf16 %v598_v50, %v597_v48 }
  0xe4   :  { %1128 = vst [vmem:[%s1481_s3 + $0xa0] sm:$0xff] %v1052_v51  }
  0xe5   :  { %1136 = vst [vmem:[%s1481_s3 + $0xe0] sm:$0xff] %v1092_v52   ;;  %v486_v55 = vpop.f32.mrf.mxu2  ;;  %v526_v56 = vpop.f32.mrf.mxu3 }
  0xe6   :  { %v408_v57 = vpop.f32.mrf.mxu0  ;;  %v448_v58 = vpop.f32.mrf.mxu1  ;;  %v487_v3 = vadd.f32 %v1316_v38, %v486_v55  ;;  %v527_v4 = vadd.f32 %v1316_v38, %v526_v56 }
  0xe7   :  { %v409_v59 = vadd.f32 %v1316_v38, %v408_v57  ;;  %v449_v60 = vadd.f32 %v1316_v38, %v448_v58 }
  0xe8   :  { %v583_v11 = vmax.f32 %v487_v3, 0.0  ;;  %v599_v12 = vmax.f32 %v527_v4, 0.0 }
  0xe9   :  { %v552_v63 = vmax.f32 %v409_v59, 0.0  ;;  %v568_v0 = vmax.f32 %v449_v60, 0.0 }
  0xeb   :  { %v977_v1 = vpack.c.bf16 %v552_v63, %v551_v61  ;;  %v1017_v2 = vpack.c.bf16 %v568_v0, %v567_v62 }
  0xed   :  { %1113 = vst [vmem:[%s1481_s3 + $0x28] sm:$0xff] %v977_v1   ;;  %v488_v5 = vpop.f32.mrf.mxu2  ;;  %v528_v6 = vpop.f32.mrf.mxu3 }
  0xee   :  { %1121 = vst [vmem:[%s1481_s3 + $0x68] sm:$0xff] %v1017_v2   ;;  %v489_v7 = vadd.f32 %v1316_v38, %v488_v5  ;;  %v529_v8 = vadd.f32 %v1316_v38, %v528_v6  ;;  %v411_v9 = vpop.f32.mrf.mxu0  ;;  %v451_v10 = vpop.f32.mrf.mxu1 }
  0xef   :  { %v412_v17 = vadd.f32 %v1316_v38, %v411_v9  ;;  %v452_v18 = vadd.f32 %v1316_v38, %v451_v10 }
  0xf0   :  { %v584_v13 = vmax.f32 %v489_v7, 0.0  ;;  %v600_v14 = vmax.f32 %v529_v8, 0.0 }
  0xf1   :  { %v553_v25 = vmax.f32 %v412_v17, 0.0  ;;  %v569_v26 = vmax.f32 %v452_v18, 0.0 }
  0xf2   :  { %v1057_v15 = vpack.c.bf16 %v584_v13, %v583_v11  ;;  %v1097_v16 = vpack.c.bf16 %v600_v14, %v599_v12 }
  0xf4   :  { %1129 = vst [vmem:[%s1481_s3 + $0xa8] sm:$0xff] %v1057_v15  }
  0xf5   :  { %1137 = vst [vmem:[%s1481_s3 + $0xe8] sm:$0xff] %v1097_v16   ;;  %v491_v19 = vpop.f32.mrf.mxu2  ;;  %v531_v20 = vpop.f32.mrf.mxu3 }
  0xf6   :  { %v413_v21 = vpop.f32.mrf.mxu0  ;;  %v453_v22 = vpop.f32.mrf.mxu1  ;;  %v492_v31 = vadd.f32 %v1316_v38, %v491_v19  ;;  %v532_v32 = vadd.f32 %v1316_v38, %v531_v20 }
  0xf7   :  { %v414_v23 = vadd.f32 %v1316_v38, %v413_v21  ;;  %v454_v24 = vadd.f32 %v1316_v38, %v453_v22 }
  0xf8   :  { %v585_v40 = vmax.f32 %v492_v31, 0.0  ;;  %v601_v41 = vmax.f32 %v532_v32, 0.0 }
  0xf9   :  { %v554_v27 = vmax.f32 %v414_v23, 0.0  ;;  %v570_v28 = vmax.f32 %v454_v24, 0.0 }
  0xfb   :  { %v982_v29 = vpack.c.bf16 %v554_v27, %v553_v25  ;;  %v1022_v30 = vpack.c.bf16 %v570_v28, %v569_v26 }
  0xfd   :  { %1114 = vst [vmem:[%s1481_s3 + $0x30] sm:$0xff] %v982_v29   ;;  %v493_v33 = vpop.f32.mrf.mxu2  ;;  %v533_v34 = vpop.f32.mrf.mxu3 }
  0xfe   :  { %1122 = vst [vmem:[%s1481_s3 + $0x70] sm:$0xff] %v1022_v30   ;;  %v494_v35 = vadd.f32 %v1316_v38, %v493_v33  ;;  %v534_v36 = vadd.f32 %v1316_v38, %v533_v34  ;;  %v416_v37 = vpop.f32.mrf.mxu0  ;;  %v456_v39 = vpop.f32.mrf.mxu1 }
  0xff   :  { %v417_v46 = vadd.f32 %v1316_v38, %v416_v37  ;;  %v457_v47 = vadd.f32 %v1316_v38, %v456_v39 }
 0x100   :  { %v586_v42 = vmax.f32 %v494_v35, 0.0  ;;  %v602_v43 = vmax.f32 %v534_v36, 0.0 }
 0x101   :  { %v555_v54 = vmax.f32 %v417_v46, 0.0  ;;  %v571_v55 = vmax.f32 %v457_v47, 0.0 }
 0x102   :  { %v1062_v44 = vpack.c.bf16 %v586_v42, %v585_v40  ;;  %v1102_v45 = vpack.c.bf16 %v602_v43, %v601_v41 }
 0x104   :  { %1130 = vst [vmem:[%s1481_s3 + $0xb0] sm:$0xff] %v1062_v44  }
 0x105   :  { %1138 = vst [vmem:[%s1481_s3 + $0xf0] sm:$0xff] %v1102_v45   ;;  %v496_v48 = vpop.f32.mrf.mxu2  ;;  %v536_v49 = vpop.f32.mrf.mxu3 }
 0x106   :  { %v418_v50 = vpop.f32.mrf.mxu0  ;;  %v458_v51 = vpop.f32.mrf.mxu1  ;;  %v497_v60 = vadd.f32 %v1316_v38, %v496_v48  ;;  %v537_v61 = vadd.f32 %v1316_v38, %v536_v49 }
 0x107   :  { %v419_v52 = vadd.f32 %v1316_v38, %v418_v50  ;;  %v459_v53 = vadd.f32 %v1316_v38, %v458_v51 }
 0x108   :  { %v587_v2 = vmax.f32 %v497_v60, 0.0  ;;  %v603_v3 = vmax.f32 %v537_v61, 0.0 }
 0x109   :  { %v556_v56 = vmax.f32 %v419_v52, 0.0  ;;  %v572_v57 = vmax.f32 %v459_v53, 0.0 }
 0x10b   :  { %v987_v58 = vpack.c.bf16 %v556_v56, %v555_v54  ;;  %v1027_v59 = vpack.c.bf16 %v572_v57, %v571_v55 }
 0x10d   :  { %1115 = vst [vmem:[%s1481_s3 + $0x38] sm:$0xff] %v987_v58   ;;  %v498_v62 = vpop.f32.mrf.mxu2  ;;  %v538_v63 = vpop.f32.mrf.mxu3 }
 0x10e   :  { %1123 = vst [vmem:[%s1481_s3 + $0x78] sm:$0xff] %v1027_v59   ;;  %v499_v0 = vadd.f32 %v1316_v38, %v498_v62  ;;  %v539_v1 = vadd.f32 %v1316_v38, %v538_v63 }
 0x110   :  { %v588_v4 = vmax.f32 %v499_v0, 0.0  ;;  %v604_v5 = vmax.f32 %v539_v1, 0.0 }
 0x112   :  { %v1067_v6 = vpack.c.bf16 %v588_v4, %v587_v2  ;;  %v1107_v7 = vpack.c.bf16 %v604_v5, %v603_v3 }
 0x114   :  { %1131 = vst [vmem:[%s1481_s3 + $0xb8] sm:$0xff] %v1067_v6  }
 0x115   :  { %1139 = vst [vmem:[%s1481_s3 + $0xf8] sm:$0xff] %v1107_v7  }

// kernel: bottleneck_forward.9
= control target key start
LH: loop header
LB: loop body
LE: loop exit
PB: predicated region body
PF: predicated region fallthrough
CT: control target
= control target key end

     0   :  { %s478_s1 = inlined_call_operand.vmem [shape: bf16[128,128], index: 1, kind: input, shape index: {}]   ;;  %s479_s2 = inlined_call_operand.vmem [shape: f32[1,128], index: 2, kind: input, shape index: {}]   ;;  %s480_s0 = inlined_call_operand.vmem [shape: bf16[128,128], index: 0, kind: input, shape index: {}]   ;;  %s481_s3 = inlined_call_operand.vmem [shape: bf16[128,128], index: 3, kind: output, shape index: {}]  }
   0x1   :  { %v310_v0 = vld [vmem:[%s478_s1 + $0x38] sm:$0xff]  ;;  %v309_v1 = vld [vmem:[%s478_s1 + $0x30] sm:$0xff]  ;;  %v308_v2 = vld [vmem:[%s478_s1 + $0x28] sm:$0xff] }
   0x2   :  { %146 = vmatpush.bf16.msra.mxu0 %v310_v0  ;;  %358 = vmatpush.bf16.msra.mxu1 %v310_v0  ;;  %v307_v3 = vld [vmem:[%s478_s1 + $0x20] sm:$0xff]  ;;  %v306_v4 = vld [vmem:[%s478_s1 + $0x18] sm:$0xff]  ;;  %v305_v5 = vld [vmem:[%s478_s1 + $0x10] sm:$0xff] }
   0x3   :  { %359 = vmatpush.bf16.msra.mxu2 %v310_v0  ;;  %360 = vmatpush.bf16.msra.mxu3 %v310_v0  ;;  %v304_v6 = vld [vmem:[%s478_s1 + $0x8] sm:$0xff]  ;;  %v303_v7 = vld [vmem:[%s478_s1] sm:$0xff]  ;;  %v297_v9 = vld [vmem:[%s480_s0 + $0x10] sm:$0xff] }
   0x4   :  { %v295_v8 = vld [vmem:[%s480_s0] sm:$0xff]  ;;  %v301_v11 = vld [vmem:[%s480_s0 + $0x30] sm:$0xff]  ;;  %v296_v12 = vld [vmem:[%s480_s0 + $0x8] sm:$0xff] }
   0x5   :  { %v299_v10 = vld [vmem:[%s480_s0 + $0x20] sm:$0xff]  ;;  %v298_v13 = vld [vmem:[%s480_s0 + $0x18] sm:$0xff]  ;;  %v300_v14 = vld [vmem:[%s480_s0 + $0x28] sm:$0xff] }
   0x6   :  { %147 = vmatpush.bf16.msra.mxu0 %v309_v1  ;;  %361 = vmatpush.bf16.msra.mxu1 %v309_v1  ;;  %v302_v15 = vld [vmem:[%s480_s0 + $0x38] sm:$0xff]  ;;  %v382_v18 = vld [vmem:[%s479_s2] ss:$0 sm:$0xff] }
   0x7   :  { %362 = vmatpush.bf16.msra.mxu2 %v309_v1  ;;  %363 = vmatpush.bf16.msra.mxu3 %v309_v1 }
   0xa   :  { %148 = vmatpush.bf16.msra.mxu0 %v308_v2  ;;  %364 = vmatpush.bf16.msra.mxu1 %v308_v2 }
   0xb   :  { %365 = vmatpush.bf16.msra.mxu2 %v308_v2  ;;  %366 = vmatpush.bf16.msra.mxu3 %v308_v2 }
   0xe   :  { %149 = vmatpush.bf16.msra.mxu0 %v307_v3  ;;  %367 = vmatpush.bf16.msra.mxu1 %v307_v3 }
   0xf   :  { %368 = vmatpush.bf16.msra.mxu2 %v307_v3  ;;  %369 = vmatpush.bf16.msra.mxu3 %v307_v3 }
  0x12   :  { %150 = vmatpush.bf16.msra.mxu0 %v306_v4  ;;  %370 = vmatpush.bf16.msra.mxu1 %v306_v4 }
  0x13   :  { %371 = vmatpush.bf16.msra.mxu2 %v306_v4  ;;  %372 = vmatpush.bf16.msra.mxu3 %v306_v4 }
  0x16   :  { %151 = vmatpush.bf16.msra.mxu0 %v305_v5  ;;  %373 = vmatpush.bf16.msra.mxu1 %v305_v5 }
  0x17   :  { %374 = vmatpush.bf16.msra.mxu2 %v305_v5  ;;  %375 = vmatpush.bf16.msra.mxu3 %v305_v5 }
  0x1a   :  { %152 = vmatpush.bf16.msra.mxu0 %v304_v6  ;;  %376 = vmatpush.bf16.msra.mxu1 %v304_v6 }
  0x1b   :  { %377 = vmatpush.bf16.msra.mxu2 %v304_v6  ;;  %378 = vmatpush.bf16.msra.mxu3 %v304_v6 }
  0x1e   :  { %153 = vmatpush.bf16.msra.mxu0 %v303_v7  ;;  %379 = vmatpush.bf16.msra.mxu1 %v303_v7 }
  0x1f   :  { %380 = vmatpush.bf16.msra.mxu2 %v303_v7  ;;  %381 = vmatpush.bf16.msra.mxu3 %v303_v7 }
  0x21   :  { %154 = vmatmul.bf16.vlgmr.msra.gmra.mxu0 %v295_v8  ;;  %164 = vmatmul.bf16.vlgmr.msra.gmra.mxu1 %v297_v9 }
  0x22   :  { %174 = vmatmul.bf16.vlgmr.msra.gmra.mxu2 %v299_v10  ;;  %184 = vmatmul.bf16.vlgmr.msra.gmra.mxu3 %v301_v11 }
  0x31   :  { %159 = vmatmul.bf16.gmra.mxu0 %v296_v12  ;;  %169 = vmatmul.bf16.gmra.mxu1 %v298_v13 }
  0x32   :  { %179 = vmatmul.bf16.gmra.mxu2 %v300_v14  ;;  %189 = vmatmul.bf16.gmra.mxu3 %v302_v15 }
  0x9e   :  { %v155_v16 = vpop.f32.mrf.mxu0  ;;  %v165_v17 = vpop.f32.mrf.mxu1 }
  0x9f   :  { %v156_v23 = vadd.f32 %v382_v18, %v155_v16  ;;  %v166_v24 = vadd.f32 %v382_v18, %v165_v17 }
  0xa5   :  { %v175_v19 = vpop.f32.mrf.mxu2  ;;  %v185_v20 = vpop.f32.mrf.mxu3 }
  0xa6   :  { %v157_v21 = vpop.f32.mrf.mxu0  ;;  %v167_v22 = vpop.f32.mrf.mxu1  ;;  %v176_v31 = vadd.f32 %v382_v18, %v175_v19  ;;  %v186_v32 = vadd.f32 %v382_v18, %v185_v20 }
  0xa7   :  { %v158_v25 = vadd.f32 %v382_v18, %v157_v21  ;;  %v168_v26 = vadd.f32 %v382_v18, %v167_v22 }
  0xa9   :  { %v314_v27 = vpack.c.bf16 %v158_v25, %v156_v23  ;;  %v324_v28 = vpack.c.bf16 %v168_v26, %v166_v24 }
  0xab   :  { %315 = vst [vmem:[%s481_s3] sm:$0xff] %v314_v27  }
  0xac   :  { %352 = vst [vmem:[%s481_s3 + $0x10] sm:$0xff] %v324_v28  }
  0xad   :  { %v177_v29 = vpop.f32.mrf.mxu2  ;;  %v187_v30 = vpop.f32.mrf.mxu3 }
  0xae   :  { %v178_v33 = vadd.f32 %v382_v18, %v177_v29  ;;  %v188_v34 = vadd.f32 %v382_v18, %v187_v30  ;;  %v160_v35 = vpop.f32.mrf.mxu0  ;;  %v170_v36 = vpop.f32.mrf.mxu1 }
  0xaf   :  { %v161_v43 = vadd.f32 %v382_v18, %v160_v35  ;;  %v171_v44 = vadd.f32 %v382_v18, %v170_v36 }
  0xb0   :  { %v334_v37 = vpack.c.bf16 %v178_v33, %v176_v31  ;;  %v344_v38 = vpack.c.bf16 %v188_v34, %v186_v32 }
  0xb2   :  { %354 = vst [vmem:[%s481_s3 + $0x20] sm:$0xff] %v334_v37  }
  0xb3   :  { %356 = vst [vmem:[%s481_s3 + $0x30] sm:$0xff] %v344_v38  }
  0xb5   :  { %v180_v39 = vpop.f32.mrf.mxu2  ;;  %v190_v40 = vpop.f32.mrf.mxu3 }
  0xb6   :  { %v162_v41 = vpop.f32.mrf.mxu0  ;;  %v172_v42 = vpop.f32.mrf.mxu1  ;;  %v181_v51 = vadd.f32 %v382_v18, %v180_v39  ;;  %v191_v52 = vadd.f32 %v382_v18, %v190_v40 }
  0xb7   :  { %v163_v45 = vadd.f32 %v382_v18, %v162_v41  ;;  %v173_v46 = vadd.f32 %v382_v18, %v172_v42 }
  0xb9   :  { %v319_v47 = vpack.c.bf16 %v163_v45, %v161_v43  ;;  %v329_v48 = vpack.c.bf16 %v173_v46, %v171_v44 }
  0xbb   :  { %351 = vst [vmem:[%s481_s3 + $0x8] sm:$0xff] %v319_v47  }
  0xbc   :  { %353 = vst [vmem:[%s481_s3 + $0x18] sm:$0xff] %v329_v48  }
  0xbd   :  { %v182_v49 = vpop.f32.mrf.mxu2  ;;  %v192_v50 = vpop.f32.mrf.mxu3 }
  0xbe   :  { %v183_v53 = vadd.f32 %v382_v18, %v182_v49  ;;  %v193_v54 = vadd.f32 %v382_v18, %v192_v50 }
  0xc0   :  { %v339_v55 = vpack.c.bf16 %v183_v53, %v181_v51  ;;  %v349_v56 = vpack.c.bf16 %v193_v54, %v191_v52 }
  0xc2   :  { %355 = vst [vmem:[%s481_s3 + $0x28] sm:$0xff] %v339_v55  }
  0xc3   :  { %357 = vst [vmem:[%s481_s3 + $0x38] sm:$0xff] %v349_v56  }

// kernel: bottleneck_forward.11
= control target key start
LH: loop header
LB: loop body
LE: loop exit
PB: predicated region body
PF: predicated region fallthrough
CT: control target
= control target key end

     0   :  { %s395_s0 = inlined_call_operand.vmem [shape: bf16[2,64,128], index: 0, kind: input, shape index: {}]   ;;  %s396_s1 = inlined_call_operand.vmem [shape: bf16[2,64,128], index: 1, kind: input, shape index: {}]   ;;  %s397_s2 = inlined_call_operand.vmem [shape: f32[2,1,128], index: 2, kind: input, shape index: {}]   ;;  %s398_s3 = inlined_call_operand.vmem [shape: bf16[2,64,128], index: 3, kind: output, shape index: {}]  }
   0x1   :  { %v171_v0 = vld [vmem:[%s395_s0] sm:$0xff]   ;;  %v274_v7 = vld [vmem:[%s395_s0 + $0x8] sm:$0xff]   ;;  %v275_v13 = vld [vmem:[%s395_s0 + $0x10] sm:$0xff]  }
   0x2   :  { %v203_v1 = vld [vmem:[%s396_s1] sm:$0xff]   ;;  %v172_v2 = vunpack.c.l.bf16 %v171_v0  ;;  %v173_v3 = vunpack.c.h.bf16 %v171_v0  ;;  %v281_v8 = vld [vmem:[%s396_s1 + $0x8] sm:$0xff]   ;;  %v176_v9 = vunpack.c.l.bf16 %v274_v7  ;;  %v177_v10 = vunpack.c.h.bf16 %v274_v7  ;;  %v282_v14 = vld [vmem:[%s396_s1 + $0x10] sm:$0xff]  }
   0x3   :  { %v204_v4 = vunpack.c.l.bf16 %v203_v1  ;;  %v205_v5 = vunpack.c.h.bf16 %v203_v1  ;;  %v295_v6 = vld [vmem:[%s397_s2] ss:$0 sm:$0xff]  ;;  %v208_v11 = vunpack.c.l.bf16 %v281_v8  ;;  %v209_v12 = vunpack.c.h.bf16 %v281_v8  ;;  %v276_v15 = vld [vmem:[%s395_s0 + $0x18] sm:$0xff]   ;;  %v296_v47 = vld [vmem:[%s397_s2 + $0x1] ss:$0 sm:$0xff] }
   0x4   :  { %v180_v18 = vunpack.c.l.bf16 %v275_v13  ;;  %v181_v19 = vunpack.c.h.bf16 %v275_v13  ;;  %v212_v22 = vunpack.c.l.bf16 %v282_v14  ;;  %v213_v23 = vunpack.c.h.bf16 %v282_v14  ;;  %v283_v24 = vld [vmem:[%s396_s1 + $0x18] sm:$0xff]   ;;  %v277_v33 = vld [vmem:[%s395_s0 + $0x20] sm:$0xff]   ;;  %v278_v48 = vld [vmem:[%s395_s0 + $0x28] sm:$0xff]  }
   0x5   :  { %v86_v16 = vmul.f32 %v295_v6, %v204_v4  ;;  %v87_v17 = vmul.f32 %v295_v6, %v205_v5  ;;  %v88_v20 = vmul.f32 %v295_v6, %v208_v11  ;;  %v89_v21 = vmul.f32 %v295_v6, %v209_v12  ;;  %v284_v42 = vld [vmem:[%s396_s1 + $0x20] sm:$0xff]   ;;  %v285_v49 = vld [vmem:[%s396_s1 + $0x28] sm:$0xff]   ;;  %v279_v58 = vld [vmem:[%s395_s0 + $0x30] sm:$0xff]  }
   0x6   :  { %v184_v27 = vunpack.c.l.bf16 %v276_v15  ;;  %v185_v28 = vunpack.c.h.bf16 %v276_v15  ;;  %v90_v31 = vmul.f32 %v295_v6, %v212_v22  ;;  %v91_v32 = vmul.f32 %v295_v6, %v213_v23  ;;  %v286_v62 = vld [vmem:[%s396_s1 + $0x30] sm:$0xff]   ;;  %v280_v7 = vld [vmem:[%s395_s0 + $0x38] sm:$0xff]  }
   0x7   :  { %v102_v25 = vadd.f32 %v172_v2, %v86_v16  ;;  %v103_v26 = vadd.f32 %v173_v3, %v87_v17  ;;  %v104_v29 = vadd.f32 %v176_v9, %v88_v20  ;;  %v105_v30 = vadd.f32 %v177_v10, %v89_v21  ;;  %v287_v12 = vld [vmem:[%s396_s1 + $0x38] sm:$0xff]  }
   0x8   :  { %v216_v36 = vunpack.c.l.bf16 %v283_v24  ;;  %v217_v37 = vunpack.c.h.bf16 %v283_v24  ;;  %v106_v40 = vadd.f32 %v180_v18, %v90_v31  ;;  %v107_v41 = vadd.f32 %v181_v19, %v91_v32 }
   0x9   :  { %v118_v34 = vmax.f32 %v102_v25, 0.0  ;;  %v119_v35 = vmax.f32 %v103_v26, 0.0  ;;  %v120_v38 = vmax.f32 %v104_v29, 0.0  ;;  %v121_v39 = vmax.f32 %v105_v30, 0.0 }
   0xa   :  { %v92_v44 = vmul.f32 %v295_v6, %v216_v36  ;;  %v93_v45 = vmul.f32 %v295_v6, %v217_v37  ;;  %v188_v46 = vunpack.c.l.bf16 %v277_v33  ;;  %v122_v51 = vmax.f32 %v106_v40, 0.0 }
   0xb   :  { %v237_v43 = vpack.c.bf16 %v119_v35, %v118_v34  ;;  %v242_v50 = vpack.c.bf16 %v121_v39, %v120_v38  ;;  %v123_v52 = vmax.f32 %v107_v41, 0.0  ;;  %v189_v53 = vunpack.c.h.bf16 %v277_v33 }
   0xc   :  { %v108_v54 = vadd.f32 %v184_v27, %v92_v44  ;;  %v109_v55 = vadd.f32 %v185_v28, %v93_v45  ;;  %v220_v56 = vunpack.c.l.bf16 %v284_v42  ;;  %v221_v57 = vunpack.c.h.bf16 %v284_v42 }
   0xd   :  { %238 = vst [vmem:[%s398_s3] sm:$0xff] %v237_v43   ;;  %v247_v59 = vpack.c.bf16 %v123_v52, %v122_v51  ;;  %v192_v60 = vunpack.c.l.bf16 %v278_v48  ;;  %v224_v61 = vunpack.c.l.bf16 %v285_v49  ;;  %v193_v3 = vunpack.c.h.bf16 %v278_v48 }
   0xe   :  { %288 = vst [vmem:[%s398_s3 + $0x8] sm:$0xff] %v242_v50   ;;  %v124_v63 = vmax.f32 %v108_v54, 0.0  ;;  %v125_v0 = vmax.f32 %v109_v55, 0.0  ;;  %v94_v1 = vmul.f32 %v296_v47, %v220_v56  ;;  %v95_v2 = vmul.f32 %v296_v47, %v221_v57 }
   0xf   :  { %289 = vst [vmem:[%s398_s3 + $0x10] sm:$0xff] %v247_v59   ;;  %v225_v4 = vunpack.c.h.bf16 %v285_v49  ;;  %v96_v5 = vmul.f32 %v296_v47, %v224_v61  ;;  %v196_v6 = vunpack.c.l.bf16 %v279_v58  ;;  %v228_v11 = vunpack.c.l.bf16 %v286_v62 }
  0x10   :  { %v252_v8 = vpack.c.bf16 %v125_v0, %v124_v63  ;;  %v110_v9 = vadd.f32 %v188_v46, %v94_v1  ;;  %v111_v10 = vadd.f32 %v189_v53, %v95_v2  ;;  %v197_v15 = vunpack.c.h.bf16 %v279_v58 }
  0x11   :  { %v97_v13 = vmul.f32 %v296_v47, %v225_v4  ;;  %v112_v14 = vadd.f32 %v192_v60, %v96_v5  ;;  %v229_v16 = vunpack.c.h.bf16 %v286_v62  ;;  %v98_v19 = vmul.f32 %v296_v47, %v228_v11 }
  0x12   :  { %290 = vst [vmem:[%s398_s3 + $0x18] sm:$0xff] %v252_v8   ;;  %v126_v17 = vmax.f32 %v110_v9, 0.0  ;;  %v127_v18 = vmax.f32 %v111_v10, 0.0  ;;  %v200_v20 = vunpack.c.l.bf16 %v280_v7  ;;  %v232_v24 = vunpack.c.l.bf16 %v287_v12 }
  0x13   :  { %v113_v21 = vadd.f32 %v193_v3, %v97_v13  ;;  %v128_v22 = vmax.f32 %v112_v14, 0.0  ;;  %v99_v23 = vmul.f32 %v296_v47, %v229_v16  ;;  %v114_v26 = vadd.f32 %v196_v6, %v98_v19 }
  0x14   :  { %v257_v25 = vpack.c.bf16 %v127_v18, %v126_v17  ;;  %v201_v27 = vunpack.c.h.bf16 %v280_v7  ;;  %v233_v28 = vunpack.c.h.bf16 %v287_v12  ;;  %v100_v31 = vmul.f32 %v296_v47, %v232_v24 }
  0x15   :  { %v129_v29 = vmax.f32 %v113_v21, 0.0  ;;  %v115_v30 = vadd.f32 %v197_v15, %v99_v23  ;;  %v130_v32 = vmax.f32 %v114_v26, 0.0 }
  0x16   :  { %291 = vst [vmem:[%s398_s3 + $0x20] sm:$0xff] %v257_v25   ;;  %v101_v33 = vmul.f32 %v296_v47, %v233_v28  ;;  %v116_v36 = vadd.f32 %v200_v20, %v100_v31 }
  0x17   :  { %v262_v34 = vpack.c.bf16 %v129_v29, %v128_v22  ;;  %v131_v35 = vmax.f32 %v115_v30, 0.0 }
  0x18   :  { %v117_v37 = vadd.f32 %v201_v27, %v101_v33  ;;  %v132_v39 = vmax.f32 %v116_v36, 0.0 }
  0x19   :  { %292 = vst [vmem:[%s398_s3 + $0x28] sm:$0xff] %v262_v34   ;;  %v267_v38 = vpack.c.bf16 %v131_v35, %v130_v32 }
  0x1a   :  { %v133_v40 = vmax.f32 %v117_v37, 0.0 }
  0x1b   :  { %293 = vst [vmem:[%s398_s3 + $0x30] sm:$0xff] %v267_v38  }
  0x1c   :  { %v272_v41 = vpack.c.bf16 %v133_v40, %v132_v39 }
  0x1e   :  { %294 = vst [vmem:[%s398_s3 + $0x38] sm:$0xff] %v272_v41  }

// kernel: bottleneck_forward.8
= control target key start
LH: loop header
LB: loop body
LE: loop exit
PB: predicated region body
PF: predicated region fallthrough
CT: control target
= control target key end

     0   :  { %s2207_s27 = smov 0   ;;  %s2209_s28 = smov 0   ;;  %s2536_s0 = inlined_call_operand.vmem [shape: bf16[2,18,9,128], index: 0, kind: input, shape index: {}, may-alias: {0,2,4}]   ;;  %s2537_s1 = inlined_call_operand.vmem [shape: bf16[2,18,9,128], index: 1, kind: input, shape index: {}, may-alias: {1,3,5}]   ;;  %s2538_s2 = inlined_call_operand.vmem [shape: bf16[2,18,9,128], index: 2, kind: input, shape index: {}, may-alias: {0,2,4}]   ;;  %s2539_s3 = inlined_call_operand.vmem [shape: bf16[2,18,9,128], index: 3, kind: input, shape index: {}, may-alias: {1,3,5}]   ;;  %s2540_s4 = inlined_call_operand.vmem [shape: bf16[2,18,9,128], index: 4, kind: input, shape index: {}, may-alias: {0,2,4}]   ;;  %s2541_s5 = inlined_call_operand.vmem [shape: bf16[2,18,9,128], index: 5, kind: input, shape index: {}, may-alias: {1,3,5}]   ;;  %s2542_s6 = inlined_call_operand.vmem [shape: bf16[9,128,128], index: 6, kind: input, shape index: {}]   ;;  %s2543_s7 = inlined_call_operand.vmem [shape: f32[1,128], index: 7, kind: input, shape index: {}]   ;;  %s2544_s8 = inlined_call_operand.vmem [shape: bf16[2,8,8,128], index: 8, kind: output, shape index: {}]  }
   0x1   :  { %2545 = sst [smem:[#allocation4_spill]] %s2536_s0  ;;  %s2211_s29 = smov 0  }
   0x2   :  { %s2213_s30 = smov 0   ;;  %s2215_s9 = smov 0  }
   0x3 LB: > { %s27_s10 = sadd.s32 1, %s2152_s29  ;;  %s30_s11 = sadd.s32 1, %s2156_s30  ;;  %s2160_s9 = sphi %s2215_s9, %s18_s9   ;;  %s2156_s30 = sphi %s2213_s30, %s2554_s30   ;;  %s2152_s29 = sphi %s2211_s29, %s2553_s29   ;;  %s2148_s28 = sphi %s2209_s28, %s2552_s28   ;;  %s2144_s27 = sphi %s2207_s27, %s2551_s27  }
   0x4   : > { %p28_p0 = scmp.ge.s32.totalorder %s27_s10, 8  ;;  %p1554_p1 = scmp.ge.s32.totalorder %s2160_s9, 1 }
   0x5   : > { %p402_p2 = scmp.lt.s32.totalorder %s2160_s9, 17 }
   0x6   : > { %s2556_s10 = smov (%p28_p0, %s27_s10), 0  ;;  %s2558_s11 = smov (!%p28_p0, %s30_s11), %s2156_s30 }
   0x7   : > { %2546 = sst [smem:[#allocation2_spill]] %s2556_s10  ;;  %p403_p3 = pnand %p1554_p1, %p402_p2 }
   0x8   : > { %p32_p4 = scmp.ge.s32.totalorder %s2558_s11, 2  ;;  %s2249_s18 = sshll.u32 (!%p403_p3), %s2144_s27, 1 }
   0x9   : > { %406 = sbr.rel (%p403_p3) target bundleno = 245 (0xf5), region = 52  ;;  %p499_p5 = scmp.lt.s32.totalorder (!%p403_p3), %s2148_s28, 1 }
   0xa   : > { %s2560_s11 = smov (%p32_p4, %s2558_s11), 0  ;;  %p501_p6 = scmp.lt.s32.totalorder (!%p403_p3), %s2249_s18, 17 }
   0xb   : > { %2547 = sst [smem:[#allocation3_spill]] %s2560_s11  ;;  %s521_s19 = sadd.s32 (!%p403_p3), 1, %s2249_s18 }
   0xc   : > { %s2548_s0 = sld [smem:[#allocation4_spill]] (!%p403_p3)  ;;  %p524_p7 = scmp.lt.s32.totalorder (!%p403_p3), %s521_s19, 17 }
   0xd   : > { %p574_p9 = scmp.lt.s32.totalorder (!%p403_p3), %s2144_s27, 7 }
   0xe   : > { %v2023_v0 = vld [vmem:[%s2542_s6 + $0x78] sm:$0xff]  ;;  %v2022_v4 = vld [vmem:[%s2542_s6 + $0x70] sm:$0xff]  ;;  %s2562_s28 = smov (!%p499_p5, %s2148_s28), 1  ;;  %v2021_v8 = vld [vmem:[%s2542_s6 + $0x68] sm:$0xff]  ;;  %s2564_s19 = smov (!%p524_p7, %s521_s19), 17 }
   0xf   : > { %v2031_v1 = vld [vmem:[%s2542_s6 + $0xb8] sm:$0xff]  ;;  %670 = vmatpush.bf16.msra.mxu0 %v2023_v0  ;;  %v2030_v5 = vld [vmem:[%s2542_s6 + $0xb0] sm:$0xff]  ;;  %s502_s14 = scalar_select %p501_p6, %s2249_s18, 17  ;;  %v2029_v9 = vld [vmem:[%s2542_s6 + $0xa8] sm:$0xff] }
  0x10   : > { %v2039_v2 = vld [vmem:[%s2542_s6 + $0xf8] sm:$0xff]  ;;  %822 = vmatpush.bf16.msra.mxu2 %v2031_v1  ;;  %v2038_v6 = vld [vmem:[%s2542_s6 + $0xf0] sm:$0xff]  ;;  %s2271_s15 = smul.u32 36, %s2562_s28  ;;  %v2037_v10 = vld [vmem:[%s2542_s6 + $0xe8] sm:$0xff]  ;;  %s1562_s25 = sshll.u32 %s2564_s19, 1 }
  0x11   : > { %v2015_v3 = vld [vmem:[%s2542_s6 + $0x38] sm:$0xff]  ;;  %901 = vmatpush.bf16.msra.mxu3 %v2039_v2  ;;  %v2014_v7 = vld [vmem:[%s2542_s6 + $0x30] sm:$0xff]  ;;  %s1556_s16 = sshll.u32 %s502_s14, 1  ;;  %v2013_v11 = vld [vmem:[%s2542_s6 + $0x28] sm:$0xff]  ;;  %s2568_s27 = smov (!%p574_p9, %s2144_s27), 7 }
  0x12   : > { %731 = vmatpush.bf16.msra.mxu1 %v2015_v3  ;;  %s2280_s22 = sadd.s32 %s2271_s15, %s1556_s16  ;;  %v2020_v12 = vld [vmem:[%s2542_s6 + $0x60] sm:$0xff]  ;;  %v2019_v16 = vld [vmem:[%s2542_s6 + $0x58] sm:$0xff]  ;;  %v2018_v22 = vld [vmem:[%s2542_s6 + $0x50] sm:$0xff]  ;;  %s2348_s19 = sadd.s32 %s2271_s15, %s1562_s25 }
  0x13   : > { %671 = vmatpush.bf16.msra.mxu0 %v2022_v4  ;;  %s1557_s12 = sshll.u32 %s2280_s22, 2  ;;  %v2028_v13 = vld [vmem:[%s2542_s6 + $0xa0] sm:$0xff]  ;;  %v2027_v17 = vld [vmem:[%s2542_s6 + $0x98] sm:$0xff]  ;;  %v2026_v23 = vld [vmem:[%s2542_s6 + $0x90] sm:$0xff]  ;;  %s1563_s24 = sshll.u32 %s2348_s19, 2 }
  0x14   : > { %823 = vmatpush.bf16.msra.mxu2 %v2030_v5  ;;  %v2036_v14 = vld [vmem:[%s2542_s6 + $0xe0] sm:$0xff]  ;;  %s2307_s13 = scalar_lea.vmem %s2548_s0, %s1557_s12  ;;  %v2035_v18 = vld [vmem:[%s2542_s6 + $0xd8] sm:$0xff]  ;;  %v2034_v25 = vld [vmem:[%s2542_s6 + $0xd0] sm:$0xff]  ;;  %s518_s10 = scalar_lea.vmem %s2537_s1, %s1557_s12 }
  0x15   : > { %902 = vmatpush.bf16.msra.mxu3 %v2038_v6  ;;  %v2012_v15 = vld [vmem:[%s2542_s6 + $0x20] sm:$0xff]  ;;  %v2011_v19 = vld [vmem:[%s2542_s6 + $0x18] sm:$0xff]  ;;  %v2010_v26 = vld [vmem:[%s2542_s6 + $0x10] sm:$0xff]  ;;  %s2385_s22 = scalar_lea.vmem %s2538_s2, %s1563_s24  ;;  %s547_s0 = sadd.s32 2, %s2249_s18 }
  0x16   : > { %732 = vmatpush.bf16.msra.mxu1 %v2014_v7  ;;  %v1673_v20 = vld [vmem:[%s2307_s13] sm:$0xf]  ;;  %v2005_v21 = vld [vmem:[%s2307_s13] sm:$0x10]  ;;  %v2017_v27 = vld [vmem:[%s2542_s6 + $0x48] sm:$0xff]  ;;  %p550_p8 = scmp.lt.s32.totalorder %s547_s0, 17  ;;  %s543_s21 = scalar_lea.vmem %s2539_s3, %s1563_s24 }
  0x17   : > { %672 = vmatpush.bf16.msra.mxu0 %v2021_v8  ;;  %v1674_v24 = vor.u32 %v2005_v21, %v1673_v20  ;;  %v2025_v28 = vld [vmem:[%s2542_s6 + $0x88] sm:$0xff]  ;;  %v2016_v32 = vld [vmem:[%s2542_s6 + $0x40] sm:$0xff]  ;;  %v2047_v36 = vld [vmem:[%s2542_s6 + $0x138] sm:$0xff]  ;;  %s1573_s23 = sshll.u32 %s2562_s28, 3 }
  0x18   : > { %824 = vmatpush.bf16.msra.mxu2 %v2029_v9  ;;  %v2033_v30 = vld [vmem:[%s2542_s6 + $0xc8] sm:$0xff]  ;;  %v2024_v33 = vld [vmem:[%s2542_s6 + $0x80] sm:$0xff]  ;;  %v2063_v37 = vld [vmem:[%s2542_s6 + $0x1b8] sm:$0xff]  ;;  %s2566_s0 = smov (!%p550_p8, %s547_s0), 17 }
  0x19   : > { %903 = vmatpush.bf16.msra.mxu3 %v2037_v10  ;;  %v769_v29 = vshll.u32 %v1674_v24, 16  ;;  %v2009_v31 = vld [vmem:[%s2542_s6 + $0x8] sm:$0xff]  ;;  %v767_v34 = vshrl.u32 %v1674_v24, 16  ;;  %v2032_v38 = vld [vmem:[%s2542_s6 + $0xc0] sm:$0xff]  ;;  %v2071_v40 = vld [vmem:[%s2542_s6 + $0x1f8] sm:$0xff]  ;;  %s1568_s26 = sshll.u32 %s2566_s0, 1 }
  0x1a   : > { %733 = vmatpush.bf16.msra.mxu1 %v2013_v11  ;;  %v2008_v39 = vld [vmem:[%s2542_s6] sm:$0xff]  ;;  %v2055_v41 = vld [vmem:[%s2542_s6 + $0x178] sm:$0xff]  ;;  %v2046_v43 = vld [vmem:[%s2542_s6 + $0x130] sm:$0xff] }
  0x1b   : > { %673 = vmatpush.bf16.msra.mxu0 %v2020_v12  ;;  %v771_v35 = vrot.slane %v769_v29, 1  ;;  %v2062_v44 = vld [vmem:[%s2542_s6 + $0x1b0] sm:$0xff]  ;;  %v582_v45 = vld [vmem:[%s518_s10] sm:$0xf]  ;;  %v2045_v50 = vld [vmem:[%s2542_s6 + $0x128] sm:$0xff] }
  0x1c   : > { %825 = vmatpush.bf16.msra.mxu2 %v2028_v13  ;;  %v2070_v46 = vld [vmem:[%s2542_s6 + $0x1f0] sm:$0xff]  ;;  %v583_v48 = vld [vmem:[%s2385_s22] sm:$0xf]  ;;  %v2061_v51 = vld [vmem:[%s2542_s6 + $0x1a8] sm:$0xff] }
  0x1d   : > { %904 = vmatpush.bf16.msra.mxu3 %v2036_v14  ;;  %v772_v42 = vor.u32 %v771_v35, %v767_v34  ;;  %v2054_v47 = vld [vmem:[%s2542_s6 + $0x170] sm:$0xff]  ;;  %v580_v49 = vld [vmem:[%s2307_s13] sm:$0xf]  ;;  %v2069_v52 = vld [vmem:[%s2542_s6 + $0x1e8] sm:$0xff]  ;;  %s554_s13 = sadd.s32 %s2271_s15, %s1568_s26 }
  0x1e   : > { %734 = vmatpush.bf16.msra.mxu1 %v2012_v15  ;;  %v2053_v53 = vld [vmem:[%s2542_s6 + $0x168] sm:$0xff]  ;;  %v2044_v54 = vld [vmem:[%s2542_s6 + $0x120] sm:$0xff]  ;;  %v2043_v58 = vld [vmem:[%s2542_s6 + $0x118] sm:$0xff]  ;;  %s1569_s15 = sshll.u32 %s554_s13, 2 }
  0x1f   : > { %674 = vmatpush.bf16.msra.mxu0 %v2019_v16  ;;  %v2060_v55 = vld [vmem:[%s2542_s6 + $0x1a0] sm:$0xff]  ;;  %v2059_v59 = vld [vmem:[%s2542_s6 + $0x198] sm:$0xff]  ;;  %v2042_v0 = vld [vmem:[%s2542_s6 + $0x110] sm:$0xff]  ;;  %s556_s0 = scalar_lea.vmem %s2540_s4, %s1569_s15  ;;  %s569_s19 = scalar_lea.vmem %s2541_s5, %s1569_s15 }
  0x20   : > { %826 = vmatpush.bf16.msra.mxu2 %v2027_v17  ;;  %v2068_v56 = vld [vmem:[%s2542_s6 + $0x1e0] sm:$0xff]  ;;  %v2067_v60 = vld [vmem:[%s2542_s6 + $0x1d8] sm:$0xff]  ;;  %v2058_v1 = vld [vmem:[%s2542_s6 + $0x190] sm:$0xff] }
  0x21   : > { %905 = vmatpush.bf16.msra.mxu3 %v2035_v18  ;;  %v2052_v57 = vld [vmem:[%s2542_s6 + $0x160] sm:$0xff]  ;;  %v2051_v61 = vld [vmem:[%s2542_s6 + $0x158] sm:$0xff]  ;;  %v2066_v3 = vld [vmem:[%s2542_s6 + $0x1d0] sm:$0xff] }
  0x22   : > { %735 = vmatpush.bf16.msra.mxu1 %v2011_v19  ;;  %v1821_v62 = vld [vmem:[%s2385_s22] sm:$0xf]  ;;  %v2006_v63 = vld [vmem:[%s2385_s22] sm:$0x10]  ;;  %v2050_v4 = vld [vmem:[%s2542_s6 + $0x150] sm:$0xff] }
  0x23   : > { %675 = vmatpush.bf16.msra.mxu0 %v2018_v22  ;;  %v1822_v2 = vor.u32 %v2006_v63, %v1821_v62  ;;  %v2041_v5 = vld [vmem:[%s2542_s6 + $0x108] sm:$0xff]  ;;  %v2040_v10 = vld [vmem:[%s2542_s6 + $0x100] sm:$0xff]  ;;  %v2079_v12 = vld [vmem:[%s2542_s6 + $0x238] sm:$0xff] }
  0x24   : > { %827 = vmatpush.bf16.msra.mxu2 %v2026_v23  ;;  %v2057_v6 = vld [vmem:[%s2542_s6 + $0x188] sm:$0xff]  ;;  %v2056_v11 = vld [vmem:[%s2542_s6 + $0x180] sm:$0xff]  ;;  %v2078_v19 = vld [vmem:[%s2542_s6 + $0x230] sm:$0xff] }
  0x25   : > { %906 = vmatpush.bf16.msra.mxu3 %v2034_v25  ;;  %v2065_v7 = vld [vmem:[%s2542_s6 + $0x1c8] sm:$0xff]  ;;  %v1019_v9 = vshll.u32 %v1822_v2, 16  ;;  %v2064_v13 = vld [vmem:[%s2542_s6 + $0x1c0] sm:$0xff]  ;;  %v1017_v15 = vshrl.u32 %v1822_v2, 16 }
  0x26   : > { %736 = vmatpush.bf16.msra.mxu1 %v2010_v26  ;;  %v2049_v8 = vld [vmem:[%s2542_s6 + $0x148] sm:$0xff]  ;;  %v2048_v14 = vld [vmem:[%s2542_s6 + $0x140] sm:$0xff]  ;;  %v2075_v26 = vld [vmem:[%s2542_s6 + $0x218] sm:$0xff] }
  0x27   : > { %676 = vmatpush.bf16.msra.mxu0 %v2017_v27  ;;  %v1021_v16 = vrot.slane %v1019_v9, 1  ;;  %v586_v17 = vld [vmem:[%s556_s0] sm:$0xf]  ;;  %v2077_v22 = vld [vmem:[%s2542_s6 + $0x228] sm:$0xff]  ;;  %v2007_v25 = vld [vmem:[%s556_s0] sm:$0x10] }
  0x28   : > { %828 = vmatpush.bf16.msra.mxu2 %v2025_v28  ;;  %v585_v18 = vld [vmem:[%s543_s21] sm:$0xf]  ;;  %v2074_v28 = vld [vmem:[%s2542_s6 + $0x210] sm:$0xff] }
  0x29   : > { %907 = vmatpush.bf16.msra.mxu3 %v2033_v30  ;;  %v588_v20 = vld [vmem:[%s569_s19] sm:$0xf]  ;;  %v1022_v21 = vor.u32 %v1021_v16, %v1017_v15  ;;  %v2073_v30 = vld [vmem:[%s2542_s6 + $0x208] sm:$0xff]  ;;  %s577_s19 = sadd.s32 %s1573_s23, %s2568_s27 }
  0x2a   : > { %737 = vmatpush.bf16.msra.mxu1 %v2009_v31  ;;  %v2076_v23 = vld [vmem:[%s2542_s6 + $0x220] sm:$0xff]  ;;  %s1574_s24 = sshll.u32 %s577_s19, 2 }
  0x2b   : > { %677 = vmatpush.bf16.msra.mxu0 %v2016_v32  ;;  %v1969_v24 = vld [vmem:[%s556_s0] sm:$0xf]  ;;  %s579_s22 = scalar_lea.vmem %s2544_s8, %s1574_s24 }
  0x2c   : > { %829 = vmatpush.bf16.msra.mxu2 %v2024_v33  ;;  %v1970_v27 = vor.u32 %v2007_v25, %v1969_v24  ;;  %v2072_v33 = vld [vmem:[%s2542_s6 + $0x200] sm:$0xff] }
  0x2d   : > { %908 = vmatpush.bf16.msra.mxu3 %v2032_v38 }
  0x2e   : > { %738 = vmatpush.bf16.msra.mxu1 %v2008_v39  ;;  %678 = vmatmul.bf16.vlgmr.msra.gmra.mxu0 %v582_v45  ;;  %v1269_v29 = vshll.u32 %v1970_v27, 16  ;;  %v1267_v31 = vshrl.u32 %v1970_v27, 16 }
  0x2f   : > { %980 = vmatpush.bf16.msrb.mxu0 %v2047_v36  ;;  %830 = vmatmul.bf16.vlgmr.msra.gmra.mxu2 %v772_v42 }
  0x30   : > { %1151 = vmatpush.bf16.msrb.mxu2 %v2063_v37  ;;  %909 = vmatmul.bf16.vlgmr.msra.gmra.mxu3 %v583_v48  ;;  %v1271_v32 = vrot.slane %v1269_v29, 1 }
  0x31   : > { %1230 = vmatpush.bf16.msrb.mxu3 %v2071_v40  ;;  %739 = vmatmul.bf16.vlgmr.msra.gmra.mxu1 %v580_v49 }
  0x32   : > { %1072 = vmatpush.bf16.msrb.mxu1 %v2055_v41  ;;  %v1272_v34 = vor.u32 %v1271_v32, %v1267_v31 }
  0x33   : > { %981 = vmatpush.bf16.msrb.mxu0 %v2046_v43 }
  0x34   : > { %1152 = vmatpush.bf16.msrb.mxu2 %v2062_v44 }
  0x35   : > { %1231 = vmatpush.bf16.msrb.mxu3 %v2070_v46 }
  0x36   : > { %1073 = vmatpush.bf16.msrb.mxu1 %v2054_v47 }
  0x37   : > { %982 = vmatpush.bf16.msrb.mxu0 %v2045_v50 }
  0x38   : > { %1153 = vmatpush.bf16.msrb.mxu2 %v2061_v51 }
  0x39   : > { %1232 = vmatpush.bf16.msrb.mxu3 %v2069_v52 }
  0x3a   : > { %1074 = vmatpush.bf16.msrb.mxu1 %v2053_v53 }
  0x3b   : > { %983 = vmatpush.bf16.msrb.mxu0 %v2044_v54 }
  0x3c   : > { %1154 = vmatpush.bf16.msrb.mxu2 %v2060_v55 }
  0x3d   : > { %1233 = vmatpush.bf16.msrb.mxu3 %v2068_v56 }
  0x3e   : > { %1075 = vmatpush.bf16.msrb.mxu1 %v2052_v57 }
  0x3f   : > { %984 = vmatpush.bf16.msrb.mxu0 %v2043_v58  ;;  %v2121_v58 = vld [vmem:[%s2543_s7] ss:$0 sm:$0xff] }
  0x40   : > { %1155 = vmatpush.bf16.msrb.mxu2 %v2059_v59 }
  0x41   : > { %1234 = vmatpush.bf16.msrb.mxu3 %v2067_v60 }
  0x42   : > { %1076 = vmatpush.bf16.msrb.mxu1 %v2051_v61 }
  0x43   : > { %985 = vmatpush.bf16.msrb.mxu0 %v2042_v0 }
  0x44   : > { %1156 = vmatpush.bf16.msrb.mxu2 %v2058_v1 }
  0x45   : > { %1235 = vmatpush.bf16.msrb.mxu3 %v2066_v3 }
  0x46   : > { %1077 = vmatpush.bf16.msrb.mxu1 %v2050_v4 }
  0x47   : > { %986 = vmatpush.bf16.msrb.mxu0 %v2041_v5 }
  0x48   : > { %1157 = vmatpush.bf16.msrb.mxu2 %v2057_v6 }
  0x49   : > { %1236 = vmatpush.bf16.msrb.mxu3 %v2065_v7 }
  0x4a   : > { %1078 = vmatpush.bf16.msrb.mxu1 %v2049_v8 }
  0x4b   : > { %987 = vmatpush.bf16.msrb.mxu0 %v2040_v10 }
  0x4c   : > { %1158 = vmatpush.bf16.msrb.mxu2 %v2056_v11 }
  0x4d   : > { %1237 = vmatpush.bf16.msrb.mxu3 %v2064_v13 }
  0x4e   : > { %1079 = vmatpush.bf16.msrb.mxu1 %v2048_v14  ;;  %988 = vmatmul.bf16.vlgmr.msrb.gmra.mxu0 %v585_v18 }
  0x4f   : > { %1322 = vmatpush.bf16.msra.mxu0 %v2079_v12  ;;  %1159 = vmatmul.bf16.vlgmr.msrb.gmra.mxu2 %v586_v17 }
  0x50   : > { %1238 = vmatmul.bf16.vlgmr.msrb.gmra.mxu3 %v588_v20 }
  0x51   : > { %1080 = vmatmul.bf16.vlgmr.msrb.gmra.mxu1 %v1022_v21 }
  0x53   : > { %1323 = vmatpush.bf16.msra.mxu0 %v2078_v19 }
  0x57   : > { %1324 = vmatpush.bf16.msra.mxu0 %v2077_v22 }
  0x5b   : > { %1325 = vmatpush.bf16.msra.mxu0 %v2076_v23 }
  0x5f   : > { %1326 = vmatpush.bf16.msra.mxu0 %v2075_v26 }
  0x63   : > { %1327 = vmatpush.bf16.msra.mxu0 %v2074_v28 }
  0x67   : > { %1328 = vmatpush.bf16.msra.mxu0 %v2073_v30 }
  0x6b   : > { %1329 = vmatpush.bf16.msra.mxu0 %v2072_v33 }
  0x6e   : > { %1330 = vmatmul.bf16.vlgmr.msra.gmra.mxu0 %v1272_v34 }
  0xab   : > { %v679_v35 = vpop.f32.mrf.mxu0 }
  0xae   : > { %v740_v36 = vpop.f32.mrf.mxu1 }
  0xaf   : > { %v741_v45 = vadd.f32 %v740_v36, %v679_v35 }
  0xb2   : > { %v831_v37 = vpop.f32.mrf.mxu2 }
  0xb3   : > { %v910_v38 = vpop.f32.mrf.mxu3  ;;  %v681_v39 = vpop.f32.mrf.mxu0  ;;  %v835_v47 = vadd.f32 %v831_v37, %v741_v45 }
  0xb5   : > { %v914_v51 = vadd.f32 %v910_v38, %v835_v47 }
  0xb6   : > { %v742_v40 = vpop.f32.mrf.mxu1 }
  0xba   : > { %v833_v41 = vpop.f32.mrf.mxu2 }
  0xbb   : > { %v912_v42 = vpop.f32.mrf.mxu3 }
  0xcb   : > { %v989_v43 = vpop.f32.mrf.mxu0 }
  0xcc   : > { %v993_v53 = vadd.f32 %v989_v43, %v914_v51 }
  0xce   : > { %v1081_v44 = vpop.f32.mrf.mxu1 }
  0xcf   : > { %v1085_v55 = vadd.f32 %v1081_v44, %v993_v53 }
  0xd2   : > { %v1160_v46 = vpop.f32.mrf.mxu2 }
  0xd3   : > { %v1239_v48 = vpop.f32.mrf.mxu3  ;;  %v991_v49 = vpop.f32.mrf.mxu0  ;;  %v1164_v56 = vadd.f32 %v1160_v46, %v1085_v55 }
  0xd5   : > { %v1243_v57 = vadd.f32 %v1239_v48, %v1164_v56 }
  0xd6   : > { %v1083_v50 = vpop.f32.mrf.mxu1 }
  0xda   : > { %v1162_v52 = vpop.f32.mrf.mxu2 }
  0xdb   : > { %v1241_v54 = vpop.f32.mrf.mxu3 }
  0xeb   : > { %v1331_v59 = vpop.f32.mrf.mxu0 }
  0xec   : > { %v1335_v60 = vadd.f32 %v1331_v59, %v1243_v57 }
  0xee   : > { %v1340_v61 = vadd.f32 %v2121_v58, %v1335_v60 }
  0xf0   : > { %v1341_v62 = vmax.f32 %v1340_v61, 0.0 }
  0xf2   : > { %v1342_v63 = vpack.c.bf16 %v1341_v62, %v1341_v62 }
  0xf3   : > { %v1333_v0 = vpop.f32.mrf.mxu0 }
  0xf4   : > { %1343 = vst [vmem:[%s579_s22] sm:$0xf] %v1342_v63 }
  0xf5 PF: > { %s18_s9 = sadd.s32 1, %s2160_s9   ;;  %s2549_s15 = sld [smem:[#allocation2_spill]] }
  0xf6   : > { %p15_p10 = scmp.ge.s32.totalorder %s18_s9, 18   ;;  %s2550_s16 = sld [smem:[#allocation3_spill]] }
  0xf7   : > { %s2551_s27 = smov %s2152_s29  ;;  %s2552_s28 = smov %s2156_s30 }
  0xf8   :  { %17 = sbr.rel (!%p15_p10) target bundleno = 3 (0x3), region = 105 }
  0xfb   : > { %s2553_s29 = smov %s2549_s15 }
  0xfc   : > { %s2554_s30 = smov %s2550_s16 }

// kernel: bottleneck_forward.10
= control target key start
LH: loop header
LB: loop body
LE: loop exit
PB: predicated region body
PF: predicated region fallthrough
CT: control target
= control target key end

     0   :  { %v339_v1 = vmov 0.0   ;;  %vm87_vm0 = vcmask 1041409   ;;  %vm200_vm1 = vcmask 261120   ;;  %s433_s1 = inlined_call_operand.vmem [shape: bf16[128,32], index: 1, kind: input, shape index: {}]   ;;  %s434_s0 = inlined_call_operand.vmem [shape: bf16[2,64,128], index: 0, kind: input, shape index: {}]   ;;  %s435_s2 = inlined_call_operand.vmem [shape: f32[1,32], index: 2, kind: input, shape index: {}]   ;;  %s436_s3 = inlined_call_operand.vmem [shape: bf16[32,128], index: 3, kind: input, shape index: {}]   ;;  %s437_s4 = inlined_call_operand.vmem [shape: f32[1,128], index: 4, kind: input, shape index: {}]   ;;  %s438_s5 = inlined_call_operand.vmem [shape: f32[2,128], index: 5, kind: output, shape index: {}]  }
   0x1   :  { %v290_v0 = vld [vmem:[%s433_s1 + $0x38] sm:$0xff]  ;;  %25 = vst [vmem:[#allocation2] sm:$0x3] %v339_v1  ;;  %v289_v2 = vld [vmem:[%s433_s1 + $0x30] sm:$0xff]  ;;  %v294_v3 = vld [vmem:[%s434_s0] sm:$0xff]  }
   0x2   :  { %166 = vmatpush.bf16.msra.mxu0 %v290_v0  ;;  %v295_v4 = vunpack.c.l.bf16 %v294_v3  ;;  %v296_v5 = vunpack.c.h.bf16 %v294_v3  ;;  %v325_v6 = vld [vmem:[%s434_s0 + $0x8] sm:$0xff]   ;;  %v328_v7 = vld [vmem:[%s434_s0 + $0x20] sm:$0xff]   ;;  %v326_v13 = vld [vmem:[%s434_s0 + $0x10] sm:$0xff]  }
   0x3   :  { %v329_v8 = vld [vmem:[%s434_s0 + $0x28] sm:$0xff]   ;;  %v299_v9 = vunpack.c.l.bf16 %v325_v6  ;;  %v311_v10 = vunpack.c.l.bf16 %v328_v7  ;;  %v312_v11 = vunpack.c.h.bf16 %v328_v7  ;;  %v330_v15 = vld [vmem:[%s434_s0 + $0x30] sm:$0xff]   ;;  %v300_v16 = vunpack.c.h.bf16 %v325_v6  ;;  %v287_v24 = vld [vmem:[%s433_s1 + $0x20] sm:$0xff] }
   0x4   :  { %v288_v12 = vld [vmem:[%s433_s1 + $0x28] sm:$0xff]  ;;  %v315_v14 = vunpack.c.l.bf16 %v329_v8  ;;  %v316_v17 = vunpack.c.h.bf16 %v329_v8  ;;  %v59_v18 = vadd.f32 %v296_v5, %v295_v4  ;;  %v303_v20 = vunpack.c.l.bf16 %v326_v13  ;;  %v327_v25 = vld [vmem:[%s434_s0 + $0x18] sm:$0xff]   ;;  %v285_v43 = vld [vmem:[%s433_s1 + $0x10] sm:$0xff] }
   0x5   :  { %v72_v19 = vadd.f32 %v312_v11, %v311_v10  ;;  %v319_v21 = vunpack.c.l.bf16 %v330_v15  ;;  %v331_v26 = vld [vmem:[%s434_s0 + $0x38] sm:$0xff]   ;;  %v304_v27 = vunpack.c.h.bf16 %v326_v13  ;;  %v320_v28 = vunpack.c.h.bf16 %v330_v15  ;;  %v292_v40 = vld [vmem:[%s436_s3 + $0x8] sm:$0xff]  ;;  %v283_v53 = vld [vmem:[%s433_s1] sm:$0xff] }
   0x6   :  { %167 = vmatpush.bf16.msra.mxu0 %v289_v2  ;;  %v60_v22 = vadd.f32 %v299_v9, %v59_v18  ;;  %v307_v31 = vunpack.c.l.bf16 %v327_v25  ;;  %v323_v32 = vunpack.c.l.bf16 %v331_v26  ;;  %v286_v35 = vld [vmem:[%s433_s1 + $0x18] sm:$0xff]  ;;  %v308_v36 = vunpack.c.h.bf16 %v327_v25  ;;  %210 = vmatpush.bf16.msra.mxu1 %v292_v40  ;;  %v284_v48 = vld [vmem:[%s433_s1 + $0x8] sm:$0xff]  ;;  %v291_v2 = vld [vmem:[%s436_s3] sm:$0xff] }
   0x7   :  { %v73_v23 = vadd.f32 %v315_v14, %v72_v19  ;;  %v324_v37 = vunpack.c.h.bf16 %v331_v26  ;;  %v333_v3 = vld [vmem:[%s435_s2] ss:$0 sm:$0xff] }
   0x8   :  { %v61_v29 = vadd.f32 %v300_v16, %v60_v22  ;;  %v26_v58 = vld [vmem:[#allocation2] sm:$0x3] }
   0x9   :  { %v74_v30 = vadd.f32 %v316_v17, %v73_v23  ;;  %v334_v8 = vld [vmem:[%s437_s4] ss:$0 sm:$0xff] }
   0xa   :  { %168 = vmatpush.bf16.msra.mxu0 %v288_v12  ;;  %v62_v33 = vadd.f32 %v303_v20, %v61_v29  ;;  %211 = vmatpush.bf16.msra.mxu1 %v291_v2 }
   0xb   :  { %v75_v34 = vadd.f32 %v319_v21, %v74_v30 }
   0xc   :  { %v63_v38 = vadd.f32 %v304_v27, %v62_v33 }
   0xd   :  { %v76_v39 = vadd.f32 %v320_v28, %v75_v34 }
   0xe   :  { %169 = vmatpush.bf16.msra.mxu0 %v287_v24  ;;  %v64_v41 = vadd.f32 %v307_v31, %v63_v38 }
   0xf   :  { %v77_v42 = vadd.f32 %v323_v32, %v76_v39 }
  0x10   :  { %v65_v44 = vadd.f32 %v308_v36, %v64_v41 }
  0x11   :  { %v78_v45 = vadd.f32 %v324_v37, %v77_v42 }
  0x12   :  { %170 = vmatpush.bf16.msra.mxu0 %v286_v35  ;;  %v66_v46 = vrot.slane %v65_v44, 4 }
  0x13   :  { %v79_v47 = vrot.slane %v78_v45, 4 }
  0x14   :  { %v67_v49 = vadd.f32 %v66_v46, %v65_v44 }
  0x15   :  { %v80_v50 = vadd.f32 %v79_v47, %v78_v45 }
  0x16   :  { %171 = vmatpush.bf16.msra.mxu0 %v285_v43  ;;  %v68_v51 = vrot.slane %v67_v49, 2 }
  0x17   :  { %v81_v52 = vrot.slane %v80_v50, 2 }
  0x18   :  { %v69_v54 = vadd.f32 %v68_v51, %v67_v49 }
  0x19   :  { %v82_v55 = vadd.f32 %v81_v52, %v80_v50 }
  0x1a   :  { %172 = vmatpush.bf16.msra.mxu0 %v284_v48  ;;  %v70_v56 = vrot.slane %v69_v54, 1 }
  0x1b   :  { %v83_v57 = vrot.slane %v82_v55, 1 }
  0x1c   :  { %v71_v59 = vadd.f32 %v70_v56, %v69_v54 }
  0x1d   :  { %v84_v60 = vadd.f32 %v83_v57, %v82_v55 }
  0x1e   :  { %173 = vmatpush.bf16.msra.mxu0 %v283_v53 }
  0x1f   :  { %v88_v61 = vsel %vm87_vm0, %v84_v60, %v71_v59 }
  0x20   :  { %v90_v62 = vadd.f32 %v88_v61, %v26_v58 }
  0x22   :  { %91 = vst [vmem:[#allocation2] sm:$0x3] %v90_v62 }
  0x29   :  { %v95_v63 = vld [vmem:[#allocation2] sm:$0x3] }
  0x2a   :  { %v96_v0 = vmul.f32 0.015625, %v95_v63 }
  0x2c   :  { %v97_v1 = vpack.c.bf16 %v96_v0, %v96_v0 }
  0x2e   :  { %174 = vmatmul.bf16.vlgmr.msra.gmra.mxu0 %v97_v1 }
  0xab   :  { %v175_v4 = vpop.f32.mrf.mxu0 }
  0xac   :  { %v176_v5 = vadd.f32 %v333_v3, %v175_v4 }
  0xae   :  { %v179_v6 = vpack.c.bf16 %v176_v5, %v176_v5 }
  0xb0   :  { %281 = vmatmul.msk.bf16.vlgmr.msra.gmra.mxu1 %vm200_vm1, %v179_v6 }
  0xb3   :  { %v177_v7 = vpop.f32.mrf.mxu0 }
 0x12d   :  { %v213_v9 = vpop.f32.mrf.mxu1 }
 0x12e   :  { %v214_v10 = vadd.f32 %v334_v8, %v213_v9 }
 0x130   :  { %v282_v11 = vmul.f32 -1.442695, %v214_v10 }
 0x132   :  { %335 = vpow2.f32 %v282_v11 }
 0x135   :  { %v215_v12 = vpop.f32.mrf.mxu1 }
 0x138   :  { %v336_v13 = vpop.eup %335 }
 0x139   :  { %v220_v14 = vadd.f32 1.0, %v336_v13 }
 0x13b   :  { %337 = vrcp.f32 %v220_v14  ;;  %v232_v18 = vand.u32 2147483648, %v220_v14  ;;  %v230_v20 = vand.u32 2147483647, %v220_v14  ;;  %vm226_vm3 = vweird.f32 %v220_v14 }
 0x13d   :  { %v233_v22 = vor.u32 1.1754944e-38, %v232_v18  ;;  %vm231_vm5 = vcmp.eq.f32.partialorder %v230_v20, 8.507059e+37 }
 0x141   :  { %v338_v15 = vpop.eup %337 }
 0x142   :  { %v222_v16 = vmul.f32 %v338_v15, %v220_v14  ;;  %vm227_vm2 = vweird.f32 %v338_v15 }
 0x143   :  { %vm228_vm4 = vmor %vm226_vm3, %vm227_vm2 }
 0x144   :  { %v223_v17 = vsub.f32 1.0, %v222_v16 }
 0x146   :  { %v224_v19 = vmul.f32 %v338_v15, %v223_v17 }
 0x148   :  { %v225_v21 = vadd.f32 %v338_v15, %v224_v19 }
 0x14a   :  { %v229_v23 = vsel %vm228_vm4, %v338_v15, %v225_v21 }
 0x14b   :  { %v234_v24 = vsel %vm231_vm5, %v233_v22, %v229_v23 }
 0x14c   :  { %236 = vst [vmem:[%s438_s5] sm:$0x3] %v234_v24 }

</bundles_post_ra>
